<compile_context>
chip_gen: v6e
topology: v6e:2x2x1
jax: 0.10.0
libtpu: 0.0.40
codegen_flags: <defaults>
</compile_context>

<pallas_src>
import functools

import jax
import jax.numpy as jnp
from jax.experimental import pallas as pl
from jax.experimental.pallas import tpu as pltpu


def _mask_attn_kernel(x_ref, pol_ref, wqkv_ref, wproj_ref, bproj_ref, o_ref,
                      heads_ref, *, num_heads, scale, eps):
    # x_ref     : (1, N, C)  one batch element (compute dtype)
    # pol_ref   : (1, 1, N)  policy row for this batch (key-token keep mask)
    # wqkv_ref  : (C, 3C)    qkv weight laid out for x @ W (PyTorch col order)
    # wproj_ref : (C, C)
    # bproj_ref : (1, C)
    # o_ref     : (1, N, C)  lane-dense output tile
    # heads_ref : (N, C)     VMEM scratch: concatenated head outputs
    x = x_ref[0]                                    # (N, C), native dtype
    N, C = x.shape
    H = num_heads
    hd = C // H
    cdt = x.dtype                                   # compute / MXU feed dtype

    # One wide matmul for q/k/v of all heads (f32 accumulation on the MXU).
    qkv = jax.lax.dot_general(
        x, wqkv_ref[...],
        dimension_numbers=(((1,), (0,)), ((), ())),
        preferred_element_type=jnp.float32)         # (N, 3C) f32

    # Scale q once (N*C VPU multiplies) instead of scaling each (N,N) score
    # tile, then drop back to the compute dtype for the MXU feeds.
    q_all = (qkv[:, :C] * jnp.float32(scale)).astype(cdt)        # (N, C)
    k_all = qkv[:, C:2 * C].astype(cdt)                          # (N, C)
    v_all = qkv[:, 2 * C:].astype(cdt)                           # (N, C)

    # Policy mask, built once per batch and shared by all heads:
    #   attn_policy[i, j] = policy[j], except the diagonal is forced to 1.
    pol_row = pol_ref[0].astype(jnp.float32)                     # (1, N)
    row = jax.lax.broadcasted_iota(jnp.int32, (N, N), 0)
    col = jax.lax.broadcasted_iota(jnp.int32, (N, N), 1)
    attn_policy = jnp.where(row == col, jnp.float32(1.0), pol_row)  # (N, N)

    eps_over_n = jnp.float32(eps / N)
    eps_f = jnp.float32(eps)

    for h in range(H):                               # H is small; traced once
        q = q_all[:, h * hd:(h + 1) * hd]            # (N, hd)
        k = k_all[:, h * hd:(h + 1) * hd]            # (N, hd)
        v = v_all[:, h * hd:(h + 1) * hd]            # (N, hd)

        # scores = (q*scale) @ k^T without materializing a transpose:
        # contract the last dims of q and k.
        s = jax.lax.dot_general(
            q, k, dimension_numbers=(((1,), (1,)), ((), ())),
            preferred_element_type=jnp.float32)      # (N, N) f32

        # softmax_with_policy (f32 math; eps=0 reduces to plain softmax).
        m = jnp.max(s, axis=-1, keepdims=True)                   # (N, 1)
        p = jnp.exp(s - m) * attn_policy                         # (N, N)
        denom = jnp.sum(p, axis=-1, keepdims=True) + eps_f       # (N, 1)
        inv = pl.reciprocal(denom, approx=True)                  # EUP slot
        attn = (p + eps_over_n) * inv                            # (N, N) f32

        # PyTorch casts attn back to the model dtype before attn @ v.
        heads_ref[:, h * hd:(h + 1) * hd] = jnp.dot(
            attn.astype(cdt), v,
            preferred_element_type=jnp.float32).astype(heads_ref.dtype)

    # Output projection fused into the same kernel (lane-dense (N,C) slab).
    y = jnp.dot(heads_ref[...], wproj_ref[...],
                preferred_element_type=jnp.float32)
    y = y + bproj_ref[...].astype(jnp.float32)                   # (N, C)
    o_ref[0] = y.astype(o_ref.dtype)


def _make_const_spec(shape, single_buffer):
    """BlockSpec for a grid-constant (weight) input, optionally single-buffered."""
    idx_map = lambda b, _n=len(shape): (0,) * _n
    if single_buffer and hasattr(pl, "Buffered"):
        try:
            return pl.BlockSpec(shape, idx_map, pipeline_mode=pl.Buffered(1))
        except TypeError:
            pass  # older BlockSpec signature: fall through to default buffering
    return pl.BlockSpec(shape, idx_map)


def _vmem_limit_bytes(N, C, itemsize, single_buffer_weights):
    f32 = 4
    w_bytes = (C * 3 * C + C * C + C) * itemsize
    w_bytes *= 1 if single_buffer_weights else 2       # Buffered(1) vs default 2
    per_step = (
        2 * N * C * itemsize        # x block (double-buffered)
        + 2 * N * itemsize          # policy row (double-buffered)
        + 2 * N * C * itemsize      # output block (double-buffered)
        + N * 3 * C * f32           # f32 qkv
        + 3 * N * C * itemsize      # q/k/v compute-dtype copies
        + 2 * N * N * f32           # attn_policy + one live (N,N) score tile
        + N * N * itemsize          # attn cast for PV
        + N * C * itemsize          # heads scratch
    )
    budget = w_bytes + per_step
    # 2x headroom, clamped to [32 MiB, 64 MiB] (64 MiB = v7x per-TC physical).
    return int(min(64 * 2 ** 20, max(2 * budget, 32 * 2 ** 20)))


def _build_call(B, N, C, dtype, num_heads, eps, cost, single_buffer_weights):
    H = num_heads
    hd = C // H
    kernel = functools.partial(_mask_attn_kernel, num_heads=H,
                               scale=hd ** (-0.5), eps=eps)
    itemsize = jnp.dtype(dtype).itemsize
    return pl.pallas_call(
        kernel,
        out_shape=jax.ShapeDtypeStruct((B, N, C), dtype),
        grid_spec=pltpu.PrefetchScalarGridSpec(
            num_scalar_prefetch=0,
            grid=(B,),
            in_specs=[
                pl.BlockSpec((1, N, C), lambda b: (b, 0, 0)),      # x
                pl.BlockSpec((1, 1, N), lambda b: (b, 0, 0)),      # policy row
                _make_const_spec((C, 3 * C), single_buffer_weights),  # w_qkv
                _make_const_spec((C, C), single_buffer_weights),      # w_proj
                _make_const_spec((1, C), single_buffer_weights),      # b_proj
            ],
            out_specs=pl.BlockSpec((1, N, C), lambda b: (b, 0, 0)),
            scratch_shapes=[pltpu.VMEM((N, C), dtype)],            # head slab
        ),
        compiler_params=pltpu.CompilerParams(
            dimension_semantics=("parallel",),                     # B >= 2 keeps both v7x TCs busy
            vmem_limit_bytes=_vmem_limit_bytes(N, C, itemsize,
                                               single_buffer_weights)),
        cost_estimate=cost,
    )


def mask_attention_forward(x, policy, w_qkv, w_proj, b_proj, *, num_heads=4,
                           eps=1e-6):
    """Pallas implementation of Mask_Attention.forward.

    x      : (B, N, C)
    policy : (B, N, 1) keep/drop mask, or None (plain softmax)
    w_qkv  : (C, 3C)  -- qkv Linear weight, transposed for x @ W
    w_proj : (C, C)   -- proj Linear weight, transposed for x @ W
    b_proj : (C,)
    """
    B, N, C = x.shape
    H = num_heads
    hd = C // H

    if policy is None:
        # With an all-ones policy and eps=0 the policy-softmax formula reduces
        # exactly to a plain softmax (denominator >= 1 since the row max is
        # subtracted), so the same kernel covers both forward paths.
        pol = jnp.ones((B, 1, N), dtype=x.dtype)
        eff_eps = 0.0
    else:
        pol = policy.reshape(B, 1, N).astype(x.dtype)
        eff_eps = eps

    b2 = b_proj.reshape(1, C)

    itemsize = jnp.dtype(x.dtype).itemsize
    flops = B * (2 * N * C * (3 * C)                 # qkv projection
                 + H * (2 * N * N * hd) * 2          # scores + attn @ v
                 + 2 * N * C * C)                    # output projection
    transcendentals = B * H * N * N                  # exp per score
    bytes_accessed = itemsize * (x.size + pol.size + w_qkv.size
                                 + w_proj.size + b2.size + B * N * C)
    cost = pl.CostEstimate(flops=flops, transcendentals=transcendentals,
                           bytes_accessed=bytes_accessed)

    args = (x, pol, w_qkv, w_proj, b2)
    try:
        return _build_call(B, N, C, x.dtype, H, eff_eps, cost,
                           single_buffer_weights=True)(*args)
    except Exception:
        # Fallback: default (double-buffered) weight specs if Buffered(1) is
        # rejected by this JAX/Mosaic version.
        return _build_call(B, N, C, x.dtype, H, eff_eps, cost,
                           single_buffer_weights=False)(*args)


def mask_attention_reference(x, policy, w_qkv, w_proj, b_proj, *, num_heads=4,
                             eps=1e-6):
    """Pure-JAX reference matching the PyTorch module."""
    B, N, C = x.shape
    H = num_heads
    hd = C // H
    scale = hd ** (-0.5)

    qkv = (x @ w_qkv).reshape(B, N, 3, H, hd).transpose(2, 0, 3, 1, 4)
    q, k, v = qkv[0], qkv[1], qkv[2]                       # (B, H, N, hd)
    attn = jnp.einsum("bhnd,bhmd->bhnm", q, k) * scale     # (B, H, N, N)

    if policy is None:
        attn = jax.nn.softmax(attn.astype(jnp.float32), axis=-1)
    else:
        attn_policy = policy.reshape(B, 1, 1, N)
        eye = jnp.eye(N, dtype=attn_policy.dtype).reshape(1, 1, N, N)
        attn_policy = attn_policy + (1.0 - attn_policy) * eye
        max_att = jnp.max(attn, axis=-1, keepdims=True)
        attn = (jnp.exp((attn - max_att).astype(jnp.float32))
                * attn_policy.astype(jnp.float32))
        attn = (attn + eps / N) / (jnp.sum(attn, axis=-1, keepdims=True) + eps)

    out = jnp.einsum("bhnm,bhmd->bhnd", attn.astype(x.dtype), v)
    out = out.transpose(0, 2, 1, 3).reshape(B, N, C)
    return out @ w_proj + b_proj


if __name__ == "__main__":
    B, N, C, H = 2, 16, 32, 4

    key = jax.random.PRNGKey(0)
    kx, kp, kw1, kw2, kb = jax.random.split(key, 5)

    x = jax.random.normal(kx, (B, N, C), dtype=jnp.float32)
    # policy in {0, 1} like a keep/drop token mask
    policy = (jax.random.uniform(kp, (B, N, 1)) > 0.3).astype(jnp.float32)

    # Deterministic synthetic parameters (qkv_bias=False in the module).
    w_qkv = jax.random.normal(kw1, (C, 3 * C), dtype=jnp.float32) * (C ** -0.5)
    w_proj = jax.random.normal(kw2, (C, C), dtype=jnp.float32) * (C ** -0.5)
    b_proj = jax.random.normal(kb, (C,), dtype=jnp.float32) * 0.01

    def rel_err(a, b):
        a = jnp.asarray(a, jnp.float32)
        b = jnp.asarray(b, jnp.float32)
        return float(jnp.linalg.norm(a - b) / (jnp.linalg.norm(b) + 1e-12))

    # f32, policy path.
    out = jax.block_until_ready(
        mask_attention_forward(x, policy, w_qkv, w_proj, b_proj, num_heads=H))
    ref = mask_attention_reference(x, policy, w_qkv, w_proj, b_proj, num_heads=H)
    assert out.shape == (B, N, C)
    assert rel_err(out, ref) < 5e-3, "policy-path mismatch vs reference"

    # f32, policy=None path (plain softmax).
    out_n = jax.block_until_ready(
        mask_attention_forward(x, None, w_qkv, w_proj, b_proj, num_heads=H))
    ref_n = mask_attention_reference(x, None, w_qkv, w_proj, b_proj, num_heads=H)
    assert rel_err(out_n, ref_n) < 5e-3, "softmax-path mismatch vs reference"

    # bf16 MXU-fed path (bf16 model semantics), checked loosely vs f32 ref.
    out_bf = jax.block_until_ready(mask_attention_forward(
        x.astype(jnp.bfloat16), policy, w_qkv.astype(jnp.bfloat16),
        w_proj.astype(jnp.bfloat16), b_proj.astype(jnp.bfloat16), num_heads=H))
    assert rel_err(out_bf, ref) < 6e-2, "bf16-path mismatch vs reference"

    print("KERNEL_OK")
</pallas_src>

<mosaic_0001>
module attributes {stable_mosaic.version = 11 : i64} {
  func.func @_mask_attn_kernel(%arg0: i32, %arg1: memref<1x16x32xf32, #tpu.memory_space<vmem>>, %arg2: memref<1x1x16xf32, #tpu.memory_space<vmem>>, %arg3: memref<32x96xf32, #tpu.memory_space<vmem>>, %arg4: memref<32x32xf32, #tpu.memory_space<vmem>>, %arg5: memref<1x32xf32, #tpu.memory_space<vmem>>, %arg6: memref<1x16x32xf32, #tpu.memory_space<vmem>>, %arg7: memref<16x32xf32, #tpu.memory_space<vmem>>) attributes {dimension_semantics = [#tpu.dimension_semantics<parallel>], iteration_bounds = array<i64: 2>, scalar_prefetch = 0 : i64, scratch_operands = 1 : i64, tpu.core_type = #tpu.core_type<tc>, window_params = [{transform_indices = @transform_0, window_bounds = array<i64: 1, 16, 32>}, {transform_indices = @transform_1, window_bounds = array<i64: 1, 1, 16>}, {pipeline_mode = #tpu.pipeline_mode<synchronous>, transform_indices = @transform_2, window_bounds = array<i64: 32, 96>}, {pipeline_mode = #tpu.pipeline_mode<synchronous>, transform_indices = @transform_3, window_bounds = array<i64: 32, 32>}, {pipeline_mode = #tpu.pipeline_mode<synchronous>, transform_indices = @transform_4, window_bounds = array<i64: 1, 32>}, {transform_indices = @transform_5, window_bounds = array<i64: 1, 16, 32>}]} {
    %c0 = arith.constant 0 : index
    %c0_0 = arith.constant 0 : index
    %c0_1 = arith.constant 0 : index
    %0 = vector.load %arg1[%c0, %c0_0, %c0_1] : memref<1x16x32xf32, #tpu.memory_space<vmem>>, vector<1x16x32xf32>
    %1 = vector.shape_cast %0 : vector<1x16x32xf32> to vector<16x32xf32>
    %c0_2 = arith.constant 0 : index
    %c0_3 = arith.constant 0 : index
    %2 = vector.load %arg3[%c0_2, %c0_3] : memref<32x96xf32, #tpu.memory_space<vmem>>, vector<32x96xf32>
    %cst = arith.constant dense<0.000000e+00> : vector<16x96xf32>
    %3 = tpu.matmul %1, %2, %cst {dimension_numbers = #tpu.dot_dimension_numbers<[1], [0], [0], [1], [0, 0, 1, 1], [], []>} : vector<16x32xf32>, vector<32x96xf32>, vector<16x96xf32> -> vector<16x96xf32>
    %4 = vector.extract_strided_slice %3 {offsets = [0, 0], sizes = [16, 32], strides = [1, 1]} : vector<16x96xf32> to vector<16x32xf32>
    %cst_4 = arith.constant 0.353553385 : f32
    %5 = vector.broadcast %cst_4 : f32 to vector<16x32xf32>
    %6 = arith.mulf %4, %5 : vector<16x32xf32>
    %7 = vector.extract_strided_slice %3 {offsets = [0, 32], sizes = [16, 32], strides = [1, 1]} : vector<16x96xf32> to vector<16x32xf32>
    %8 = vector.extract_strided_slice %3 {offsets = [0, 64], sizes = [16, 32], strides = [1, 1]} : vector<16x96xf32> to vector<16x32xf32>
    %c0_5 = arith.constant 0 : index
    %c0_6 = arith.constant 0 : index
    %c0_7 = arith.constant 0 : index
    %9 = vector.load %arg2[%c0_5, %c0_6, %c0_7] : memref<1x1x16xf32, #tpu.memory_space<vmem>>, vector<1x1x16xf32>
    %10 = vector.shape_cast %9 : vector<1x1x16xf32> to vector<1x16xf32>
    %11 = tpu.iota {dimensions = array<i32: 0>} : vector<16x16xi32>
    %12 = tpu.iota {dimensions = array<i32: 1>} : vector<16x16xi32>
    %13 = arith.cmpi eq, %11, %12 : vector<16x16xi32>
    %cst_8 = arith.constant 1.000000e+00 : f32
    %14 = vector.broadcast %cst_8 : f32 to vector<16x16xf32>
    %15 = vector.shape_cast %10 : vector<1x16xf32> to vector<1x16xf32>
    %16 = vector.broadcast %15 : vector<1x16xf32> to vector<16x16xf32>
    %17 = arith.select %13, %14, %16 : vector<16x16xi1>, vector<16x16xf32>
    %18 = vector.extract_strided_slice %6 {offsets = [0, 0], sizes = [16, 8], strides = [1, 1]} : vector<16x32xf32> to vector<16x8xf32>
    %19 = vector.extract_strided_slice %7 {offsets = [0, 0], sizes = [16, 8], strides = [1, 1]} : vector<16x32xf32> to vector<16x8xf32>
    %20 = vector.extract_strided_slice %8 {offsets = [0, 0], sizes = [16, 8], strides = [1, 1]} : vector<16x32xf32> to vector<16x8xf32>
    %cst_9 = arith.constant dense<0.000000e+00> : vector<16x16xf32>
    %21 = tpu.matmul %18, %19, %cst_9 {dimension_numbers = #tpu.dot_dimension_numbers<[1], [1], [0], [0], [0, 0, 1, 0], [], []>} : vector<16x8xf32>, vector<16x8xf32>, vector<16x16xf32> -> vector<16x16xf32>
    %cst_10 = arith.constant dense<0xFF800000> : vector<16xf32>
    %22 = vector.multi_reduction <maximumf>, %21, %cst_10 [1] : vector<16x16xf32> to vector<16xf32>
    %23 = vector.shape_cast %22 : vector<16xf32> to vector<16x1xf32>
    %24 = vector.broadcast %23 : vector<16x1xf32> to vector<16x16xf32>
    %25 = arith.subf %21, %24 : vector<16x16xf32>
    %26 = math.exp %25 : vector<16x16xf32>
    %27 = arith.mulf %26, %17 : vector<16x16xf32>
    %cst_11 = arith.constant dense<0.000000e+00> : vector<16xf32>
    %28 = vector.multi_reduction <add>, %27, %cst_11 [1] : vector<16x16xf32> to vector<16xf32>
    %29 = vector.shape_cast %28 : vector<16xf32> to vector<16x1xf32>
    %cst_12 = arith.constant 9.99999997E-7 : f32
    %30 = vector.broadcast %cst_12 : f32 to vector<16x1xf32>
    %31 = arith.addf %29, %30 : vector<16x1xf32>
    %32 = tpu.reciprocal %31 {approx = true} : vector<16x1xf32> -> vector<16x1xf32>
    %cst_13 = arith.constant 6.24999998E-8 : f32
    %33 = vector.broadcast %cst_13 : f32 to vector<16x16xf32>
    %34 = arith.addf %27, %33 : vector<16x16xf32>
    %35 = vector.broadcast %32 : vector<16x1xf32> to vector<16x16xf32>
    %36 = arith.mulf %34, %35 : vector<16x16xf32>
    %cst_14 = arith.constant dense<0.000000e+00> : vector<16x8xf32>
    %37 = tpu.matmul %36, %20, %cst_14 {dimension_numbers = #tpu.dot_dimension_numbers<[1], [0], [0], [1], [0, 0, 1, 1], [], []>} : vector<16x16xf32>, vector<16x8xf32>, vector<16x8xf32> -> vector<16x8xf32>
    %c0_15 = arith.constant 0 : index
    %c0_16 = arith.constant 0 : index
    %38 = vector.load %arg7[%c0_15, %c0_16] : memref<16x32xf32, #tpu.memory_space<vmem>>, vector<16x8xf32>
    tpu.vector_store %arg7[%c0_15, %c0_16], %37 {strides = array<i32>} : memref<16x32xf32, #tpu.memory_space<vmem>>, vector<16x8xf32>,
    %39 = vector.extract_strided_slice %6 {offsets = [0, 8], sizes = [16, 8], strides = [1, 1]} : vector<16x32xf32> to vector<16x8xf32>
    %40 = vector.extract_strided_slice %7 {offsets = [0, 8], sizes = [16, 8], strides = [1, 1]} : vector<16x32xf32> to vector<16x8xf32>
    %41 = vector.extract_strided_slice %8 {offsets = [0, 8], sizes = [16, 8], strides = [1, 1]} : vector<16x32xf32> to vector<16x8xf32>
    %cst_17 = arith.constant dense<0.000000e+00> : vector<16x16xf32>
    %42 = tpu.matmul %39, %40, %cst_17 {dimension_numbers = #tpu.dot_dimension_numbers<[1], [1], [0], [0], [0, 0, 1, 0], [], []>} : vector<16x8xf32>, vector<16x8xf32>, vector<16x16xf32> -> vector<16x16xf32>
    %cst_18 = arith.constant dense<0xFF800000> : vector<16xf32>
    %43 = vector.multi_reduction <maximumf>, %42, %cst_18 [1] : vector<16x16xf32> to vector<16xf32>
    %44 = vector.shape_cast %43 : vector<16xf32> to vector<16x1xf32>
    %45 = vector.broadcast %44 : vector<16x1xf32> to vector<16x16xf32>
    %46 = arith.subf %42, %45 : vector<16x16xf32>
    %47 = math.exp %46 : vector<16x16xf32>
    %48 = arith.mulf %47, %17 : vector<16x16xf32>
    %cst_19 = arith.constant dense<0.000000e+00> : vector<16xf32>
    %49 = vector.multi_reduction <add>, %48, %cst_19 [1] : vector<16x16xf32> to vector<16xf32>
    %50 = vector.shape_cast %49 : vector<16xf32> to vector<16x1xf32>
    %cst_20 = arith.constant 9.99999997E-7 : f32
    %51 = vector.broadcast %cst_20 : f32 to vector<16x1xf32>
    %52 = arith.addf %50, %51 : vector<16x1xf32>
    %53 = tpu.reciprocal %52 {approx = true} : vector<16x1xf32> -> vector<16x1xf32>
    %cst_21 = arith.constant 6.24999998E-8 : f32
    %54 = vector.broadcast %cst_21 : f32 to vector<16x16xf32>
    %55 = arith.addf %48, %54 : vector<16x16xf32>
    %56 = vector.broadcast %53 : vector<16x1xf32> to vector<16x16xf32>
    %57 = arith.mulf %55, %56 : vector<16x16xf32>
    %cst_22 = arith.constant dense<0.000000e+00> : vector<16x8xf32>
    %58 = tpu.matmul %57, %41, %cst_22 {dimension_numbers = #tpu.dot_dimension_numbers<[1], [0], [0], [1], [0, 0, 1, 1], [], []>} : vector<16x16xf32>, vector<16x8xf32>, vector<16x8xf32> -> vector<16x8xf32>
    %c0_23 = arith.constant 0 : index
    %c8 = arith.constant 8 : index
    %59 = vector.load %arg7[%c0_23, %c8] : memref<16x32xf32, #tpu.memory_space<vmem>>, vector<16x8xf32>
    tpu.vector_store %arg7[%c0_23, %c8], %58 {strides = array<i32>} : memref<16x32xf32, #tpu.memory_space<vmem>>, vector<16x8xf32>,
    %60 = vector.extract_strided_slice %6 {offsets = [0, 16], sizes = [16, 8], strides = [1, 1]} : vector<16x32xf32> to vector<16x8xf32>
    %61 = vector.extract_strided_slice %7 {offsets = [0, 16], sizes = [16, 8], strides = [1, 1]} : vector<16x32xf32> to vector<16x8xf32>
    %62 = vector.extract_strided_slice %8 {offsets = [0, 16], sizes = [16, 8], strides = [1, 1]} : vector<16x32xf32> to vector<16x8xf32>
    %cst_24 = arith.constant dense<0.000000e+00> : vector<16x16xf32>
    %63 = tpu.matmul %60, %61, %cst_24 {dimension_numbers = #tpu.dot_dimension_numbers<[1], [1], [0], [0], [0, 0, 1, 0], [], []>} : vector<16x8xf32>, vector<16x8xf32>, vector<16x16xf32> -> vector<16x16xf32>
    %cst_25 = arith.constant dense<0xFF800000> : vector<16xf32>
    %64 = vector.multi_reduction <maximumf>, %63, %cst_25 [1] : vector<16x16xf32> to vector<16xf32>
    %65 = vector.shape_cast %64 : vector<16xf32> to vector<16x1xf32>
    %66 = vector.broadcast %65 : vector<16x1xf32> to vector<16x16xf32>
    %67 = arith.subf %63, %66 : vector<16x16xf32>
    %68 = math.exp %67 : vector<16x16xf32>
    %69 = arith.mulf %68, %17 : vector<16x16xf32>
    %cst_26 = arith.constant dense<0.000000e+00> : vector<16xf32>
    %70 = vector.multi_reduction <add>, %69, %cst_26 [1] : vector<16x16xf32> to vector<16xf32>
    %71 = vector.shape_cast %70 : vector<16xf32> to vector<16x1xf32>
    %cst_27 = arith.constant 9.99999997E-7 : f32
    %72 = vector.broadcast %cst_27 : f32 to vector<16x1xf32>
    %73 = arith.addf %71, %72 : vector<16x1xf32>
    %74 = tpu.reciprocal %73 {approx = true} : vector<16x1xf32> -> vector<16x1xf32>
    %cst_28 = arith.constant 6.24999998E-8 : f32
    %75 = vector.broadcast %cst_28 : f32 to vector<16x16xf32>
    %76 = arith.addf %69, %75 : vector<16x16xf32>
    %77 = vector.broadcast %74 : vector<16x1xf32> to vector<16x16xf32>
    %78 = arith.mulf %76, %77 : vector<16x16xf32>
    %cst_29 = arith.constant dense<0.000000e+00> : vector<16x8xf32>
    %79 = tpu.matmul %78, %62, %cst_29 {dimension_numbers = #tpu.dot_dimension_numbers<[1], [0], [0], [1], [0, 0, 1, 1], [], []>} : vector<16x16xf32>, vector<16x8xf32>, vector<16x8xf32> -> vector<16x8xf32>
    %c0_30 = arith.constant 0 : index
    %c16 = arith.constant 16 : index
    %80 = vector.load %arg7[%c0_30, %c16] : memref<16x32xf32, #tpu.memory_space<vmem>>, vector<16x8xf32>
    tpu.vector_store %arg7[%c0_30, %c16], %79 {strides = array<i32>} : memref<16x32xf32, #tpu.memory_space<vmem>>, vector<16x8xf32>,
    %81 = vector.extract_strided_slice %6 {offsets = [0, 24], sizes = [16, 8], strides = [1, 1]} : vector<16x32xf32> to vector<16x8xf32>
    %82 = vector.extract_strided_slice %7 {offsets = [0, 24], sizes = [16, 8], strides = [1, 1]} : vector<16x32xf32> to vector<16x8xf32>
    %83 = vector.extract_strided_slice %8 {offsets = [0, 24], sizes = [16, 8], strides = [1, 1]} : vector<16x32xf32> to vector<16x8xf32>
    %cst_31 = arith.constant dense<0.000000e+00> : vector<16x16xf32>
    %84 = tpu.matmul %81, %82, %cst_31 {dimension_numbers = #tpu.dot_dimension_numbers<[1], [1], [0], [0], [0, 0, 1, 0], [], []>} : vector<16x8xf32>, vector<16x8xf32>, vector<16x16xf32> -> vector<16x16xf32>
    %cst_32 = arith.constant dense<0xFF800000> : vector<16xf32>
    %85 = vector.multi_reduction <maximumf>, %84, %cst_32 [1] : vector<16x16xf32> to vector<16xf32>
    %86 = vector.shape_cast %85 : vector<16xf32> to vector<16x1xf32>
    %87 = vector.broadcast %86 : vector<16x1xf32> to vector<16x16xf32>
    %88 = arith.subf %84, %87 : vector<16x16xf32>
    %89 = math.exp %88 : vector<16x16xf32>
    %90 = arith.mulf %89, %17 : vector<16x16xf32>
    %cst_33 = arith.constant dense<0.000000e+00> : vector<16xf32>
    %91 = vector.multi_reduction <add>, %90, %cst_33 [1] : vector<16x16xf32> to vector<16xf32>
    %92 = vector.shape_cast %91 : vector<16xf32> to vector<16x1xf32>
    %cst_34 = arith.constant 9.99999997E-7 : f32
    %93 = vector.broadcast %cst_34 : f32 to vector<16x1xf32>
    %94 = arith.addf %92, %93 : vector<16x1xf32>
    %95 = tpu.reciprocal %94 {approx = true} : vector<16x1xf32> -> vector<16x1xf32>
    %cst_35 = arith.constant 6.24999998E-8 : f32
    %96 = vector.broadcast %cst_35 : f32 to vector<16x16xf32>
    %97 = arith.addf %90, %96 : vector<16x16xf32>
    %98 = vector.broadcast %95 : vector<16x1xf32> to vector<16x16xf32>
    %99 = arith.mulf %97, %98 : vector<16x16xf32>
    %cst_36 = arith.constant dense<0.000000e+00> : vector<16x8xf32>
    %100 = tpu.matmul %99, %83, %cst_36 {dimension_numbers = #tpu.dot_dimension_numbers<[1], [0], [0], [1], [0, 0, 1, 1], [], []>} : vector<16x16xf32>, vector<16x8xf32>, vector<16x8xf32> -> vector<16x8xf32>
    %c0_37 = arith.constant 0 : index
    %c24 = arith.constant 24 : index
    %101 = vector.load %arg7[%c0_37, %c24] : memref<16x32xf32, #tpu.memory_space<vmem>>, vector<16x8xf32>
    tpu.vector_store %arg7[%c0_37, %c24], %100 {strides = array<i32>} : memref<16x32xf32, #tpu.memory_space<vmem>>, vector<16x8xf32>,
    %c0_38 = arith.constant 0 : index
    %c0_39 = arith.constant 0 : index
    %102 = vector.load %arg7[%c0_38, %c0_39] : memref<16x32xf32, #tpu.memory_space<vmem>>, vector<16x32xf32>
    %c0_40 = arith.constant 0 : index
    %c0_41 = arith.constant 0 : index
    %103 = vector.load %arg4[%c0_40, %c0_41] : memref<32x32xf32, #tpu.memory_space<vmem>>, vector<32x32xf32>
    %cst_42 = arith.constant dense<0.000000e+00> : vector<16x32xf32>
    %104 = tpu.matmul %102, %103, %cst_42 {dimension_numbers = #tpu.dot_dimension_numbers<[1], [0], [0], [1], [0, 0, 1, 1], [], []>} : vector<16x32xf32>, vector<32x32xf32>, vector<16x32xf32> -> vector<16x32xf32>
    %c0_43 = arith.constant 0 : index
    %c0_44 = arith.constant 0 : index
    %105 = vector.load %arg5[%c0_43, %c0_44] : memref<1x32xf32, #tpu.memory_space<vmem>>, vector<1x32xf32>
    %106 = vector.broadcast %105 : vector<1x32xf32> to vector<16x32xf32>
    %107 = arith.addf %104, %106 : vector<16x32xf32>
    %c0_45 = arith.constant 0 : index
    %c0_46 = arith.constant 0 : index
    %c0_47 = arith.constant 0 : index
    %108 = vector.load %arg6[%c0_45, %c0_46, %c0_47] : memref<1x16x32xf32, #tpu.memory_space<vmem>>, vector<1x16x32xf32>
    %109 = vector.shape_cast %108 : vector<1x16x32xf32> to vector<16x32xf32>
    %110 = vector.shape_cast %107 : vector<16x32xf32> to vector<1x16x32xf32>
    tpu.vector_store %arg6[%c0_45, %c0_46, %c0_47], %110 {strides = array<i32>} : memref<1x16x32xf32, #tpu.memory_space<vmem>>, vector<1x16x32xf32>,
    return
  }
  func.func @transform_0(%arg0: i32) -> (i32, i32, i32) {
    %c0_i32 = arith.constant 0 : i32
    %c0_i32_0 = arith.constant 0 : i32
    %c0_i32_1 = arith.constant 0 : i32
    return %arg0, %c0_i32, %c0_i32_0 : i32, i32, i32
  }
  func.func @transform_1(%arg0: i32) -> (i32, i32, i32) {
    %c0_i32 = arith.constant 0 : i32
    %c0_i32_0 = arith.constant 0 : i32
    %c0_i32_1 = arith.constant 0 : i32
    return %arg0, %c0_i32, %c0_i32_0 : i32, i32, i32
  }
  func.func @transform_2(%arg0: i32) -> (i32, i32) {
    %c0_i32 = arith.constant 0 : i32
    %c0_i32_0 = arith.constant 0 : i32
    %c0_i32_1 = arith.constant 0 : i32
    return %c0_i32, %c0_i32_0 : i32, i32
  }
  func.func @transform_3(%arg0: i32) -> (i32, i32) {
    %c0_i32 = arith.constant 0 : i32
    %c0_i32_0 = arith.constant 0 : i32
    %c0_i32_1 = arith.constant 0 : i32
    return %c0_i32, %c0_i32_0 : i32, i32
  }
  func.func @transform_4(%arg0: i32) -> (i32, i32) {
    %c0_i32 = arith.constant 0 : i32
    %c0_i32_0 = arith.constant 0 : i32
    %c0_i32_1 = arith.constant 0 : i32
    return %c0_i32, %c0_i32_0 : i32, i32
  }
  func.func @transform_5(%arg0: i32) -> (i32, i32, i32) {
    %c0_i32 = arith.constant 0 : i32
    %c0_i32_0 = arith.constant 0 : i32
    %c0_i32_1 = arith.constant 0 : i32
    return %arg0, %c0_i32, %c0_i32_0 : i32, i32, i32
  }
}

module attributes {stable_mosaic.version = 11 : i64} {
  func.func @_mask_attn_kernel(%arg0: i32, %arg1: memref<1x16x32xf32, #tpu.memory_space<vmem>>, %arg2: memref<1x1x16xf32, #tpu.memory_space<vmem>>, %arg3: memref<32x96xf32, #tpu.memory_space<vmem>>, %arg4: memref<32x32xf32, #tpu.memory_space<vmem>>, %arg5: memref<1x32xf32, #tpu.memory_space<vmem>>, %arg6: memref<1x16x32xf32, #tpu.memory_space<vmem>>, %arg7: memref<16x32xf32, #tpu.memory_space<vmem>>) attributes {dimension_semantics = [#tpu.dimension_semantics<parallel>], iteration_bounds = array<i64: 2>, scalar_prefetch = 0 : i64, scratch_operands = 1 : i64, tpu.core_type = #tpu.core_type<tc>, window_params = [{transform_indices = @transform_0, window_bounds = array<i64: 1, 16, 32>}, {transform_indices = @transform_1, window_bounds = array<i64: 1, 1, 16>}, {pipeline_mode = #tpu.pipeline_mode<synchronous>, transform_indices = @transform_2, window_bounds = array<i64: 32, 96>}, {pipeline_mode = #tpu.pipeline_mode<synchronous>, transform_indices = @transform_3, window_bounds = array<i64: 32, 32>}, {pipeline_mode = #tpu.pipeline_mode<synchronous>, transform_indices = @transform_4, window_bounds = array<i64: 1, 32>}, {transform_indices = @transform_5, window_bounds = array<i64: 1, 16, 32>}]} {
    %c0 = arith.constant 0 : index
    %c0_0 = arith.constant 0 : index
    %c0_1 = arith.constant 0 : index
    %0 = vector.load %arg1[%c0, %c0_0, %c0_1] : memref<1x16x32xf32, #tpu.memory_space<vmem>>, vector<1x16x32xf32>
    %1 = vector.shape_cast %0 : vector<1x16x32xf32> to vector<16x32xf32>
    %c0_2 = arith.constant 0 : index
    %c0_3 = arith.constant 0 : index
    %2 = vector.load %arg3[%c0_2, %c0_3] : memref<32x96xf32, #tpu.memory_space<vmem>>, vector<32x96xf32>
    %cst = arith.constant dense<0.000000e+00> : vector<16x96xf32>
    %3 = tpu.matmul %1, %2, %cst {dimension_numbers = #tpu.dot_dimension_numbers<[1], [0], [0], [1], [0, 0, 1, 1], [], []>} : vector<16x32xf32>, vector<32x96xf32>, vector<16x96xf32> -> vector<16x96xf32>
    %4 = vector.extract_strided_slice %3 {offsets = [0, 0], sizes = [16, 32], strides = [1, 1]} : vector<16x96xf32> to vector<16x32xf32>
    %cst_4 = arith.constant 0.353553385 : f32
    %5 = vector.broadcast %cst_4 : f32 to vector<16x32xf32>
    %6 = arith.mulf %4, %5 : vector<16x32xf32>
    %7 = vector.extract_strided_slice %3 {offsets = [0, 32], sizes = [16, 32], strides = [1, 1]} : vector<16x96xf32> to vector<16x32xf32>
    %8 = vector.extract_strided_slice %3 {offsets = [0, 64], sizes = [16, 32], strides = [1, 1]} : vector<16x96xf32> to vector<16x32xf32>
    %c0_5 = arith.constant 0 : index
    %c0_6 = arith.constant 0 : index
    %c0_7 = arith.constant 0 : index
    %9 = vector.load %arg2[%c0_5, %c0_6, %c0_7] : memref<1x1x16xf32, #tpu.memory_space<vmem>>, vector<1x1x16xf32>
    %10 = vector.shape_cast %9 : vector<1x1x16xf32> to vector<1x16xf32>
    %11 = tpu.iota {dimensions = array<i32: 0>} : vector<16x16xi32>
    %12 = tpu.iota {dimensions = array<i32: 1>} : vector<16x16xi32>
    %13 = arith.cmpi eq, %11, %12 : vector<16x16xi32>
    %cst_8 = arith.constant 1.000000e+00 : f32
    %14 = vector.broadcast %cst_8 : f32 to vector<16x16xf32>
    %15 = vector.shape_cast %10 : vector<1x16xf32> to vector<1x16xf32>
    %16 = vector.broadcast %15 : vector<1x16xf32> to vector<16x16xf32>
    %17 = arith.select %13, %14, %16 : vector<16x16xi1>, vector<16x16xf32>
    %18 = vector.extract_strided_slice %6 {offsets = [0, 0], sizes = [16, 8], strides = [1, 1]} : vector<16x32xf32> to vector<16x8xf32>
    %19 = vector.extract_strided_slice %7 {offsets = [0, 0], sizes = [16, 8], strides = [1, 1]} : vector<16x32xf32> to vector<16x8xf32>
    %20 = vector.extract_strided_slice %8 {offsets = [0, 0], sizes = [16, 8], strides = [1, 1]} : vector<16x32xf32> to vector<16x8xf32>
    %cst_9 = arith.constant dense<0.000000e+00> : vector<16x16xf32>
    %21 = tpu.matmul %18, %19, %cst_9 {dimension_numbers = #tpu.dot_dimension_numbers<[1], [1], [0], [0], [0, 0, 1, 0], [], []>} : vector<16x8xf32>, vector<16x8xf32>, vector<16x16xf32> -> vector<16x16xf32>
    %cst_10 = arith.constant dense<0xFF800000> : vector<16xf32>
    %22 = vector.multi_reduction <maximumf>, %21, %cst_10 [1] : vector<16x16xf32> to vector<16xf32>
    %23 = vector.shape_cast %22 : vector<16xf32> to vector<16x1xf32>
    %24 = vector.broadcast %23 : vector<16x1xf32> to vector<16x16xf32>
    %25 = arith.subf %21, %24 : vector<16x16xf32>
    %26 = math.exp %25 : vector<16x16xf32>
    %27 = arith.mulf %26, %17 : vector<16x16xf32>
    %cst_11 = arith.constant dense<0.000000e+00> : vector<16xf32>
    %28 = vector.multi_reduction <add>, %27, %cst_11 [1] : vector<16x16xf32> to vector<16xf32>
    %29 = vector.shape_cast %28 : vector<16xf32> to vector<16x1xf32>
    %cst_12 = arith.constant 9.99999997E-7 : f32
    %30 = vector.broadcast %cst_12 : f32 to vector<16x1xf32>
    %31 = arith.addf %29, %30 : vector<16x1xf32>
    %32 = tpu.reciprocal %31 {approx = true} : vector<16x1xf32> -> vector<16x1xf32>
    %cst_13 = arith.constant 6.24999998E-8 : f32
    %33 = vector.broadcast %cst_13 : f32 to vector<16x16xf32>
    %34 = arith.addf %27, %33 : vector<16x16xf32>
    %35 = vector.broadcast %32 : vector<16x1xf32> to vector<16x16xf32>
    %36 = arith.mulf %34, %35 : vector<16x16xf32>
    %cst_14 = arith.constant dense<0.000000e+00> : vector<16x8xf32>
    %37 = tpu.matmul %36, %20, %cst_14 {dimension_numbers = #tpu.dot_dimension_numbers<[1], [0], [0], [1], [0, 0, 1, 1], [], []>} : vector<16x16xf32>, vector<16x8xf32>, vector<16x8xf32> -> vector<16x8xf32>
    %c0_15 = arith.constant 0 : index
    %c0_16 = arith.constant 0 : index
    %38 = vector.load %arg7[%c0_15, %c0_16] : memref<16x32xf32, #tpu.memory_space<vmem>>, vector<16x8xf32>
    tpu.vector_store %arg7[%c0_15, %c0_16], %37 {strides = array<i32>} : memref<16x32xf32, #tpu.memory_space<vmem>>, vector<16x8xf32>,
    %39 = vector.extract_strided_slice %6 {offsets = [0, 8], sizes = [16, 8], strides = [1, 1]} : vector<16x32xf32> to vector<16x8xf32>
    %40 = vector.extract_strided_slice %7 {offsets = [0, 8], sizes = [16, 8], strides = [1, 1]} : vector<16x32xf32> to vector<16x8xf32>
    %41 = vector.extract_strided_slice %8 {offsets = [0, 8], sizes = [16, 8], strides = [1, 1]} : vector<16x32xf32> to vector<16x8xf32>
    %cst_17 = arith.constant dense<0.000000e+00> : vector<16x16xf32>
    %42 = tpu.matmul %39, %40, %cst_17 {dimension_numbers = #tpu.dot_dimension_numbers<[1], [1], [0], [0], [0, 0, 1, 0], [], []>} : vector<16x8xf32>, vector<16x8xf32>, vector<16x16xf32> -> vector<16x16xf32>
    %cst_18 = arith.constant dense<0xFF800000> : vector<16xf32>
    %43 = vector.multi_reduction <maximumf>, %42, %cst_18 [1] : vector<16x16xf32> to vector<16xf32>
    %44 = vector.shape_cast %43 : vector<16xf32> to vector<16x1xf32>
    %45 = vector.broadcast %44 : vector<16x1xf32> to vector<16x16xf32>
    %46 = arith.subf %42, %45 : vector<16x16xf32>
    %47 = math.exp %46 : vector<16x16xf32>
    %48 = arith.mulf %47, %17 : vector<16x16xf32>
    %cst_19 = arith.constant dense<0.000000e+00> : vector<16xf32>
    %49 = vector.multi_reduction <add>, %48, %cst_19 [1] : vector<16x16xf32> to vector<16xf32>
    %50 = vector.shape_cast %49 : vector<16xf32> to vector<16x1xf32>
    %cst_20 = arith.constant 9.99999997E-7 : f32
    %51 = vector.broadcast %cst_20 : f32 to vector<16x1xf32>
    %52 = arith.addf %50, %51 : vector<16x1xf32>
    %53 = tpu.reciprocal %52 {approx = true} : vector<16x1xf32> -> vector<16x1xf32>
    %cst_21 = arith.constant 6.24999998E-8 : f32
    %54 = vector.broadcast %cst_21 : f32 to vector<16x16xf32>
    %55 = arith.addf %48, %54 : vector<16x16xf32>
    %56 = vector.broadcast %53 : vector<16x1xf32> to vector<16x16xf32>
    %57 = arith.mulf %55, %56 : vector<16x16xf32>
    %cst_22 = arith.constant dense<0.000000e+00> : vector<16x8xf32>
    %58 = tpu.matmul %57, %41, %cst_22 {dimension_numbers = #tpu.dot_dimension_numbers<[1], [0], [0], [1], [0, 0, 1, 1], [], []>} : vector<16x16xf32>, vector<16x8xf32>, vector<16x8xf32> -> vector<16x8xf32>
    %c0_23 = arith.constant 0 : index
    %c8 = arith.constant 8 : index
    %59 = vector.load %arg7[%c0_23, %c8] : memref<16x32xf32, #tpu.memory_space<vmem>>, vector<16x8xf32>
    tpu.vector_store %arg7[%c0_23, %c8], %58 {strides = array<i32>} : memref<16x32xf32, #tpu.memory_space<vmem>>, vector<16x8xf32>,
    %60 = vector.extract_strided_slice %6 {offsets = [0, 16], sizes = [16, 8], strides = [1, 1]} : vector<16x32xf32> to vector<16x8xf32>
    %61 = vector.extract_strided_slice %7 {offsets = [0, 16], sizes = [16, 8], strides = [1, 1]} : vector<16x32xf32> to vector<16x8xf32>
    %62 = vector.extract_strided_slice %8 {offsets = [0, 16], sizes = [16, 8], strides = [1, 1]} : vector<16x32xf32> to vector<16x8xf32>
    %cst_24 = arith.constant dense<0.000000e+00> : vector<16x16xf32>
    %63 = tpu.matmul %60, %61, %cst_24 {dimension_numbers = #tpu.dot_dimension_numbers<[1], [1], [0], [0], [0, 0, 1, 0], [], []>} : vector<16x8xf32>, vector<16x8xf32>, vector<16x16xf32> -> vector<16x16xf32>
    %cst_25 = arith.constant dense<0xFF800000> : vector<16xf32>
    %64 = vector.multi_reduction <maximumf>, %63, %cst_25 [1] : vector<16x16xf32> to vector<16xf32>
    %65 = vector.shape_cast %64 : vector<16xf32> to vector<16x1xf32>
    %66 = vector.broadcast %65 : vector<16x1xf32> to vector<16x16xf32>
    %67 = arith.subf %63, %66 : vector<16x16xf32>
    %68 = math.exp %67 : vector<16x16xf32>
    %69 = arith.mulf %68, %17 : vector<16x16xf32>
    %cst_26 = arith.constant dense<0.000000e+00> : vector<16xf32>
    %70 = vector.multi_reduction <add>, %69, %cst_26 [1] : vector<16x16xf32> to vector<16xf32>
    %71 = vector.shape_cast %70 : vector<16xf32> to vector<16x1xf32>
    %cst_27 = arith.constant 9.99999997E-7 : f32
    %72 = vector.broadcast %cst_27 : f32 to vector<16x1xf32>
    %73 = arith.addf %71, %72 : vector<16x1xf32>
    %74 = tpu.reciprocal %73 {approx = true} : vector<16x1xf32> -> vector<16x1xf32>
    %cst_28 = arith.constant 6.24999998E-8 : f32
    %75 = vector.broadcast %cst_28 : f32 to vector<16x16xf32>
    %76 = arith.addf %69, %75 : vector<16x16xf32>
    %77 = vector.broadcast %74 : vector<16x1xf32> to vector<16x16xf32>
    %78 = arith.mulf %76, %77 : vector<16x16xf32>
    %cst_29 = arith.constant dense<0.000000e+00> : vector<16x8xf32>
    %79 = tpu.matmul %78, %62, %cst_29 {dimension_numbers = #tpu.dot_dimension_numbers<[1], [0], [0], [1], [0, 0, 1, 1], [], []>} : vector<16x16xf32>, vector<16x8xf32>, vector<16x8xf32> -> vector<16x8xf32>
    %c0_30 = arith.constant 0 : index
    %c16 = arith.constant 16 : index
    %80 = vector.load %arg7[%c0_30, %c16] : memref<16x32xf32, #tpu.memory_space<vmem>>, vector<16x8xf32>
    tpu.vector_store %arg7[%c0_30, %c16], %79 {strides = array<i32>} : memref<16x32xf32, #tpu.memory_space<vmem>>, vector<16x8xf32>,
    %81 = vector.extract_strided_slice %6 {offsets = [0, 24], sizes = [16, 8], strides = [1, 1]} : vector<16x32xf32> to vector<16x8xf32>
    %82 = vector.extract_strided_slice %7 {offsets = [0, 24], sizes = [16, 8], strides = [1, 1]} : vector<16x32xf32> to vector<16x8xf32>
    %83 = vector.extract_strided_slice %8 {offsets = [0, 24], sizes = [16, 8], strides = [1, 1]} : vector<16x32xf32> to vector<16x8xf32>
    %cst_31 = arith.constant dense<0.000000e+00> : vector<16x16xf32>
    %84 = tpu.matmul %81, %82, %cst_31 {dimension_numbers = #tpu.dot_dimension_numbers<[1], [1], [0], [0], [0, 0, 1, 0], [], []>} : vector<16x8xf32>, vector<16x8xf32>, vector<16x16xf32> -> vector<16x16xf32>
    %cst_32 = arith.constant dense<0xFF800000> : vector<16xf32>
    %85 = vector.multi_reduction <maximumf>, %84, %cst_32 [1] : vector<16x16xf32> to vector<16xf32>
    %86 = vector.shape_cast %85 : vector<16xf32> to vector<16x1xf32>
    %87 = vector.broadcast %86 : vector<16x1xf32> to vector<16x16xf32>
    %88 = arith.subf %84, %87 : vector<16x16xf32>
    %89 = math.exp %88 : vector<16x16xf32>
    %90 = arith.mulf %89, %17 : vector<16x16xf32>
    %cst_33 = arith.constant dense<0.000000e+00> : vector<16xf32>
    %91 = vector.multi_reduction <add>, %90, %cst_33 [1] : vector<16x16xf32> to vector<16xf32>
    %92 = vector.shape_cast %91 : vector<16xf32> to vector<16x1xf32>
    %cst_34 = arith.constant 9.99999997E-7 : f32
    %93 = vector.broadcast %cst_34 : f32 to vector<16x1xf32>
    %94 = arith.addf %92, %93 : vector<16x1xf32>
    %95 = tpu.reciprocal %94 {approx = true} : vector<16x1xf32> -> vector<16x1xf32>
    %cst_35 = arith.constant 6.24999998E-8 : f32
    %96 = vector.broadcast %cst_35 : f32 to vector<16x16xf32>
    %97 = arith.addf %90, %96 : vector<16x16xf32>
    %98 = vector.broadcast %95 : vector<16x1xf32> to vector<16x16xf32>
    %99 = arith.mulf %97, %98 : vector<16x16xf32>
    %cst_36 = arith.constant dense<0.000000e+00> : vector<16x8xf32>
    %100 = tpu.matmul %99, %83, %cst_36 {dimension_numbers = #tpu.dot_dimension_numbers<[1], [0], [0], [1], [0, 0, 1, 1], [], []>} : vector<16x16xf32>, vector<16x8xf32>, vector<16x8xf32> -> vector<16x8xf32>
    %c0_37 = arith.constant 0 : index
    %c24 = arith.constant 24 : index
    %101 = vector.load %arg7[%c0_37, %c24] : memref<16x32xf32, #tpu.memory_space<vmem>>, vector<16x8xf32>
    tpu.vector_store %arg7[%c0_37, %c24], %100 {strides = array<i32>} : memref<16x32xf32, #tpu.memory_space<vmem>>, vector<16x8xf32>,
    %c0_38 = arith.constant 0 : index
    %c0_39 = arith.constant 0 : index
    %102 = vector.load %arg7[%c0_38, %c0_39] : memref<16x32xf32, #tpu.memory_space<vmem>>, vector<16x32xf32>
    %c0_40 = arith.constant 0 : index
    %c0_41 = arith.constant 0 : index
    %103 = vector.load %arg4[%c0_40, %c0_41] : memref<32x32xf32, #tpu.memory_space<vmem>>, vector<32x32xf32>
    %cst_42 = arith.constant dense<0.000000e+00> : vector<16x32xf32>
    %104 = tpu.matmul %102, %103, %cst_42 {dimension_numbers = #tpu.dot_dimension_numbers<[1], [0], [0], [1], [0, 0, 1, 1], [], []>} : vector<16x32xf32>, vector<32x32xf32>, vector<16x32xf32> -> vector<16x32xf32>
    %c0_43 = arith.constant 0 : index
    %c0_44 = arith.constant 0 : index
    %105 = vector.load %arg5[%c0_43, %c0_44] : memref<1x32xf32, #tpu.memory_space<vmem>>, vector<1x32xf32>
    %106 = vector.broadcast %105 : vector<1x32xf32> to vector<16x32xf32>
    %107 = arith.addf %104, %106 : vector<16x32xf32>
    %c0_45 = arith.constant 0 : index
    %c0_46 = arith.constant 0 : index
    %c0_47 = arith.constant 0 : index
    %108 = vector.load %arg6[%c0_45, %c0_46, %c0_47] : memref<1x16x32xf32, #tpu.memory_space<vmem>>, vector<1x16x32xf32>
    %109 = vector.shape_cast %108 : vector<1x16x32xf32> to vector<16x32xf32>
    %110 = vector.shape_cast %107 : vector<16x32xf32> to vector<1x16x32xf32>
    tpu.vector_store %arg6[%c0_45, %c0_46, %c0_47], %110 {strides = array<i32>} : memref<1x16x32xf32, #tpu.memory_space<vmem>>, vector<1x16x32xf32>,
    return
  }
  func.func @transform_0(%arg0: i32) -> (i32, i32, i32) {
    %c0_i32 = arith.constant 0 : i32
    %c0_i32_0 = arith.constant 0 : i32
    %c0_i32_1 = arith.constant 0 : i32
    return %arg0, %c0_i32, %c0_i32_0 : i32, i32, i32
  }
  func.func @transform_1(%arg0: i32) -> (i32, i32, i32) {
    %c0_i32 = arith.constant 0 : i32
    %c0_i32_0 = arith.constant 0 : i32
    %c0_i32_1 = arith.constant 0 : i32
    return %arg0, %c0_i32, %c0_i32_0 : i32, i32, i32
  }
  func.func @transform_2(%arg0: i32) -> (i32, i32) {
    %c0_i32 = arith.constant 0 : i32
    %c0_i32_0 = arith.constant 0 : i32
    %c0_i32_1 = arith.constant 0 : i32
    return %c0_i32, %c0_i32_0 : i32, i32
  }
  func.func @transform_3(%arg0: i32) -> (i32, i32) {
    %c0_i32 = arith.constant 0 : i32
    %c0_i32_0 = arith.constant 0 : i32
    %c0_i32_1 = arith.constant 0 : i32
    return %c0_i32, %c0_i32_0 : i32, i32
  }
  func.func @transform_4(%arg0: i32) -> (i32, i32) {
    %c0_i32 = arith.constant 0 : i32
    %c0_i32_0 = arith.constant 0 : i32
    %c0_i32_1 = arith.constant 0 : i32
    return %c0_i32, %c0_i32_0 : i32, i32
  }
  func.func @transform_5(%arg0: i32) -> (i32, i32, i32) {
    %c0_i32 = arith.constant 0 : i32
    %c0_i32_0 = arith.constant 0 : i32
    %c0_i32_1 = arith.constant 0 : i32
    return %arg0, %c0_i32, %c0_i32_0 : i32, i32, i32
  }
}

</mosaic_0001>

<bundles_post_ra>
// kernel: tpu_custom_call.1
= control target key start
LH: loop header
LB: loop body
LE: loop exit
PB: predicated region body
PF: predicated region fallthrough
CT: control target
= control target key end

     0   :  { %s2391_s0 = inlined_call_operand.hbm [shape: f32[2,16,32], index: 0, kind: input, shape index: {}]   ;;  %s2392_s1 = inlined_call_operand.hbm [shape: f32[2,1,16], index: 1, kind: input, shape index: {}]   ;;  %s2393_s2 = inlined_call_operand.hbm [shape: f32[32,96], index: 2, kind: input, shape index: {}]   ;;  %s2394_s3 = inlined_call_operand.hbm [shape: f32[32,32], index: 3, kind: input, shape index: {}]   ;;  %s2395_s4 = inlined_call_operand.vmem [shape: f32[1,32], index: 4, kind: input, shape index: {}]   ;;  %s2396_s5 = inlined_call_operand.hbm [shape: f32[2,16,32], index: 5, kind: output, shape index: {}]  }
   0x1   :  { %2401 = sst [smem:[#allocation18_spill]] %s2391_s0 }
   0x2   :  { %2402 = sst [smem:[#allocation19_spill]] %s2393_s2 }
   0x3   :  { %2403 = sst [smem:[#allocation20_spill]] %s2394_s3 }
   0x4   :  { %10 = vsyncpa [#allocation4], 0 }
   0x5   :  { %12 = vsyncpa [#allocation4 + $0x1], 0 }
   0x6   :  { %13 = vsyncpa [#allocation7], 0 }
   0x7   :  { %15 = vsyncpa [#allocation7 + $0x1], 0 }
   0x8   :  { %16 = vsyncpa [#allocation10], 0 }
   0x9   :  { %17 = vsyncpa [#allocation5], 0 }
   0xa   :  { %19 = vsyncpa [#allocation5 + $0x1], 0  ;;  %s2027_s18 = smov 0   ;;  %s2029_s19 = smov 0  }
   0xb   :  { %s2031_s20 = smov 0   ;;  %s2033_s21 = smov 0  }
   0xc LB: > { %s2048_s22 = sadd.s32 4294967295, %s1973_s21   ;;  %s1495_s23 = sadd.s32 4294967294, %s1973_s21   ;;  %s1973_s21 = sphi %s2033_s21, %s2429_s21   ;;  %s1969_s20 = sphi %s2031_s20, %s2428_s20   ;;  %s1965_s19 = sphi %s2029_s19, %s2427_s19   ;;  %s1961_s18 = sphi %s2027_s18, %s2426_s18  }
   0xd   : > { %p45_p0 = scmp.ne.s32.totalorder %s1965_s19, %s1961_s18  ;;  %p2397_p1 = scmp.eq.s32.totalorder %s2048_s22, 0 }
   0xe   : > { %p158_p2 = scmp.eq.s32.totalorder %s2048_s22, 1  ;;  %p164_p3 = scmp.eq.s32.totalorder %s1495_s23, 1 }
   0xf   : > { %p2057_p4 = por %p2397_p1, %p45_p0  ;;  %p1496_p5 = scmp.ge.s32.totalorder %s1973_s21, 1 }
  0x10   : > { %p2062_p6 = por %p164_p3, %p45_p0  ;;  %p171_p7 = scmp.lt.s32.totalorder %s1973_s21, 3 }
  0x11   : > { %s2404_s24 = scalar_select %p2057_p4, 1, 0 }
  0x12   : > { %s2405_s25 = scalar_select %p2062_p6, 1, 0 }
  0x13   : > { %p2067_p8 = pnand %p1496_p5, %p171_p7  ;;  %s1975_s27 = smov [#allocation8]  }
  0x14   : > { %s183_s28 = sshll.u32 %s1975_s27, 4  ;;  %s1976_s30 = smov [#allocation9]   ;;  %s184_s28 = int_to_ptr.vmem [resolvable:$true] %s183_s28 }
  0x15   : > { %s2406_s26 = scalar_select %p2067_p8, 1, 0 }
  0x16   : > { %p1682_p9 = pneg %p2067_p8  ;;  %s196_s6 = sshll.u32 %s1976_s30, 4  ;;  %s197_s6 = int_to_ptr.vmem [resolvable:$true] %s196_s6 }
  0x17   : > { %s1800_s7 = scalar_lea.vmem %s184_s28, 512  ;;  %p1808_p5 = scmp.lt.s32.totalorder %s184_s28, %s184_s28 }
  0x18   : > { %p2076_p11 = pnand %p1682_p9, %p2397_p1  ;;  %p1801_p13 = scmp.ne.s32.totalorder %s184_s28, %s1800_s7 }
  0x19   : > { %p1809_p7 = scmp.lt.s32.totalorder %s1800_s7, %s1800_s7 }
  0x1a   : > { %p1791_p12 = pneg %p2076_p11 }
  0x1b   : > { %p1810_p10 = por %p1809_p7, %p1808_p5 }
  0x1c   : > { %p1803_p0 = pnand %p1801_p13, %p1791_p12 }
  0x1e   : > { %p1804_p3 = pneg %p1803_p0 }
  0x20   : > { %p1811_p9 = pnand %p1810_p10, %p1804_p3 }
  0x22   : > { %1814 = shalt.err (!%p1811_p9)
}
  0x23   : > { %s1977_s8 = smov 128   ;;  %s1978_s9 = smov 8  }
  0x24   : > { %s2408_s2 = sld [smem:[#allocation19_spill]]  ;;  %s1826_s12 = scalar_lea.vmem %s197_s6, 512 }
  0x25   : > { %p1827_p13 = scmp.ne.s32.totalorder %s197_s6, %s1826_s12  ;;  %p1834_p10 = scmp.lt.s32.totalorder %s197_s6, %s197_s6 }
  0x26   : > { %p1835_p3 = scmp.lt.s32.totalorder %s1826_s12, %s1826_s12 }
  0x27   : > { %p1829_p0 = pnand %p1827_p13, %p1791_p12 }
  0x28   : > { %p1836_p7 = por %p1835_p3, %p1834_p10 }
  0x29   : > { %p1830_p5 = pneg %p1829_p0 }
  0x2a   : > { %1685 = dma.hbm_to_vmem [thread:$0]  (!%p2076_p11), %s2408_s2, 512, %s184_s28, [#allocation7], %s1977_s8, %s1977_s8, %s1978_s9  }
  0x2b   : > { %p1837_p9 = pnand %p1836_p7, %p1830_p5 }
  0x2d   : > { %1840 = shalt.err (!%p1837_p9)
}
  0x2e   : > { %s2409_s3 = sld [smem:[#allocation20_spill]]  ;;  %s2105_s15 = sadd.s32 1, %s1973_s21  }
  0x2f   : > { %s32_s16 = sadd.s32 1, %s1969_s20  ;;  %s29_s17 = ssub.s32 %s1973_s21, %s2105_s15 }
  0x30   : > { %p39_p12 = scmp.ne.s32.totalorder %s1969_s20, %s1965_s19  ;;  %p30_p13 = scmp.eq.s32.totalorder %s29_s17, 0 }
  0x31   : > { %p40_p0 = scmp.eq.s32.totalorder %s1973_s21, 0  ;;  %p1702_p10 = scmp.lt.s32.totalorder %s1973_s21, 2 }
  0x32   : > { %p2115_p5 = por %p158_p2, %p39_p12  ;;  %s2124_s28 = sand.u32 1, %s1969_s20  }
  0x33   : > { %s2121_s27 = scalar_select %p30_p13, %s1969_s20, %s32_s16  }
  0x34   : > { %1688 = dma.hbm_to_vmem [thread:$0]  (!%p2076_p11), %s2409_s3, 512, %s197_s6, [#allocation10], %s1977_s8, %s1977_s8, %s1978_s9  }
  0x35   : > { %s2410_s23 = scalar_select %p2115_p5, 1, 0 }
  0x36   : > { %2411 = sst [smem:[#allocation17_spill]] %s2121_s27  ;;  %p41_p3 = por %p40_p0, %p39_p12 }
  0x37   : > { %s1500_s29 = sshll.u32 %s2124_s28, 4  ;;  %s1544_s30 = sshll.u32 %s1973_s21, 8 }
  0x38   : > { %s2412_s0 = sld [smem:[#allocation18_spill]]  ;;  %s217_s11 = scalar_lea.vmem [#allocation3], %s1500_s29 }
  0x39   : > { %s224_s12 = sshll.u32 %s217_s11, 4  ;;  %p2135_p2 = pnand %p1702_p10, %p41_p3  ;;  %s2133_s12 = int_to_ptr.vmem [resolvable:$true] %s224_s12 }
  0x3b   : > { %p1843_p7 = pneg %p2135_p2 }
  0x3e   : > { %s2131_s10 = scalar_lea.hbm %s2412_s0, %s1544_s30  ;;  %s1846_s6 = scalar_lea.hbm %s2412_s0, 512 }
  0x3f   : > { %s1841_s17 = scalar_lea.hbm %s2131_s10, 256  ;;  %p1847_p13 = scmp.lt.s32.totalorder %s2131_s10, %s2412_s0 }
  0x40   : > { %p1842_p11 = scmp.ne.s32.totalorder %s2131_s10, %s1841_s17  ;;  %p1848_p0 = scmp.lt.s32.totalorder %s1846_s6, %s1841_s17 }
  0x42   : > { %p1844_p9 = pnand %p1843_p7, %p1842_p11  ;;  %p1849_p10 = por %p1848_p0, %p1847_p13 }
  0x44   : > { %p1845_p12 = pneg %p1844_p9 }
  0x46   : > { %p1850_p3 = pnand %p1849_p10, %p1845_p12 }
  0x48   : > { %1853 = shalt.err (!%p1850_p3)
}
  0x49   : > { %s1854_s14 = scalar_lea.vmem %s2133_s12, 256  ;;  %s1979_s29 = smov [#allocation3]  }
  0x4a   : > { %p1855_p1 = scmp.ne.s32.totalorder %s2133_s12, %s1854_s14  ;;  %s1859_s30 = sshll.u32 %s1979_s29, 4  ;;  %s1860_s30 = int_to_ptr.vmem [resolvable:$false] %s1859_s30 }
  0x4b   : > { %s1861_s16 = scalar_lea.vmem %s1860_s30, 512  ;;  %p1862_p6 = scmp.lt.s32.totalorder %s2133_s12, %s1860_s30 }
  0x4c   : > { %p1857_p11 = pnand %p1855_p1, %p1843_p7  ;;  %p1863_p5 = scmp.lt.s32.totalorder %s1861_s16, %s1854_s14 }
  0x4e   : > { %p1858_p9 = pneg %p1857_p11  ;;  %p1864_p4 = por %p1863_p5, %p1862_p6 }
  0x50   : > { %p1865_p13 = pnand %p1864_p4, %p1858_p9 }
  0x52   : > { %1868 = shalt.err (!%p1865_p13)
}
  0x53   : > { %s2414_s17 = scalar_lea.sflag [#allocation4], %s2124_s28  ;;  %s1503_s6 = sshll.u32 %s1973_s21, 4 }
  0x54   : > { %1692 = dma.hbm_to_vmem [thread:$0]  (!%p2135_p2), %s2131_s10, 256, %s2133_s12, %s2414_s17, %s1977_s8, %s1977_s8, %s1978_s9  }
  0x55   : > { %s237_s7 = scalar_lea.vmem [#allocation6], %s2124_s28  ;;  %s242_s29 = scalar_lea.hbm %s2392_s1, %s1503_s6 }
  0x56   : > { %s244_s14 = sshll.u32 %s237_s7, 4  ;;  %s2415_s30 = sand.u32 1, %s1973_s21   ;;  %s245_s14 = int_to_ptr.vmem [resolvable:$true] %s244_s14 }
  0x57   : > { %s235_s0 = scalar_lea.sflag [#allocation7], %s2415_s30  ;;  %s1869_s2 = scalar_lea.hbm %s242_s29, 16 }
  0x58   : > { %p1870_p1 = scmp.ne.s32.totalorder %s242_s29, %s1869_s2  ;;  %s1874_s8 = scalar_lea.hbm %s2392_s1, 32 }
  0x59   : > { %p1875_p5 = scmp.lt.s32.totalorder %s242_s29, %s2392_s1  ;;  %p1876_p12 = scmp.lt.s32.totalorder %s1874_s8, %s1869_s2 }
  0x5a   : > { %p1872_p4 = pnand %p1870_p1, %p1843_p7 }
  0x5b   : > { %p1877_p0 = por %p1876_p12, %p1875_p5 }
  0x5c   : > { %p1873_p6 = pneg %p1872_p4 }
  0x5e   : > { %p1878_p10 = pnand %p1877_p0, %p1873_p6 }
  0x60   : > { %1881 = shalt.err (!%p1878_p10)
}
  0x61   : > { %s1882_s10 = scalar_lea.vmem %s245_s14, 16  ;;  %s1980_s12 = smov [#allocation6]  }
  0x62   : > { %p1883_p3 = scmp.ne.s32.totalorder %s245_s14, %s1882_s10  ;;  %s1887_s17 = sshll.u32 %s1980_s12, 4  ;;  %s1888_s17 = int_to_ptr.vmem [resolvable:$false] %s1887_s17 }
  0x63   : > { %s1889_s3 = scalar_lea.vmem %s1888_s17, 32  ;;  %p1890_p13 = scmp.lt.s32.totalorder %s245_s14, %s1888_s17 }
  0x64   : > { %p1885_p11 = pnand %p1883_p3, %p1843_p7  ;;  %p1891_p1 = scmp.lt.s32.totalorder %s1889_s3, %s1882_s10 }
  0x66   : > { %p1886_p9 = pneg %p1885_p11  ;;  %p1892_p4 = por %p1891_p1, %p1890_p13 }
  0x68   : > { %p1893_p8 = pnand %p1892_p4, %p1886_p9 }
  0x6a   : > { %1896 = shalt.err (!%p1893_p8)
}
  0x6b   : > { %1695 = dma.hbm_to_vmem [thread:$0]  (!%p2135_p2), %s242_s29, 16, %s245_s14, %s235_s0  }
  0x6c   : > { %p2416_p6 = scmp.ne.s32.totalorder %s2406_s26, 0 }
  0x6d   : > { %s2194_s2 = sand.u32 (!%p2416_p6), 1, %s1965_s19   ;;  %p2417_p7 = scmp.ne.s32.totalorder (!%p2416_p6), %s2404_s24, 0 }
  0x6e   : > { %253 = sbr.rel (%p2416_p6) target bundleno = 3062 (0xbf6), region = 40  ;;  %s1505_s27 = sshll.u32 (!%p2416_p6), %s2194_s2, 4 }
  0x6f   : > { %s256_s6 = scalar_lea.sflag (!%p2416_p6), [#allocation4], %s2194_s2  ;;  %s259_s7 = scalar_lea.vmem (!%p2416_p6), [#allocation3], %s1505_s27 }
  0x73   : > { %1940 = dma.done.wait (%p2417_p7), %s256_s6, 256  }
  0x74   : > { %1942 = vsyncadd (%p2417_p7), %s256_s6, 4294967040  ;;  %s264_s0 = sand.u32 1, %s2048_s22   ;;  %s267_s13 = scalar_lea.vmem [#allocation6], %s2194_s2 }
  0x75   : > { %s265_s26 = scalar_lea.sflag [#allocation7], %s264_s0 }
  0x76   : > { %1944 = dma.done.wait (%p2417_p7), %s265_s26, 16  }
  0x77   : > { %1946 = vsyncadd (%p2417_p7), %s265_s26, 4294967280  ;;  %p2418_p8 = scmp.eq.s32.totalorder %s2048_s22, 0 }
  0x79   : > { %1948 = dma.done.wait (%p2418_p8), [#allocation7], 512   ;;  %p2419_p2 = pmov %p2418_p8 }
  0x7b   : > { %1950 = vsyncadd (%p2419_p2), [#allocation7], 4294966784  ;;  %p2420_p5 = pmov %p2419_p2 }
  0x7c   : > { %p2421_p12 = pmov %p2419_p2 }
  0x7d   : > { %1952 = dma.done.wait (%p2420_p5), [#allocation10], 512  }
  0x7e   : > { %1954 = vsyncadd (%p2421_p12), [#allocation10], 4294966784  ;;  %vm312_vm0 = vcmask 261120   ;;  %v311_v0 = vld [vmem:[#allocation8 + $0x18] sm:$0xff]  ;;  %v310_v1 = vld [vmem:[#allocation8 + $0x10] sm:$0xff]  ;;  %s1981_s24 = smov 96   ;;  %v397_v21 = vlaneseq }
  0x7f   : > { %1590 = vmatprep.subr.mxu0 %v311_v0  ;;  %v306_v2 = vld [vmem:[%s259_s7] sm:$0xff]  ;;  %v307_v5 = vld [vmem:[%s259_s7 + $0x8] sm:$0xff]  ;;  %vm418_vm1 = vcmask 64512   ;;  %vm504_vm2 = vcmask 130048   ;;  %s1982_s14 = smov 64   ;;  %s1983_s16 = smov 120  }
  0x80   : > { %1591 = vmatpush3.msra.mxu0 %v311_v0  ;;  %v309_v3 = vld [vmem:[#allocation8 + $0x8] sm:$0xff]  ;;  %1598 = vmatprep.mubr.msk.f32.mxu0 %vm312_vm0, %v306_v2  ;;  %v308_v4 = vld [vmem:[#allocation8] sm:$0xff]  ;;  %v398_v23 = vshrl.u32 %v397_v21, 7  ;;  %v401_v24 = vand.u32 127, %v397_v21  ;;  %s1984_s11 = smov 88   ;;  %s1985_s29 = smov 56  }
  0x81   : > { %1592 = vmatprep.subr.mxu0 %v310_v1  ;;  %v1511_v25 = vld [vmem:[%s267_s13] ss:$0 sm:$0xff]  ;;  %s1986_s30 = smov 80   ;;  %s1987_s8 = smov 112   ;;  %vm836_vm5 = vcmask 130112   ;;  %vm1053_vm6 = vcmask 195712  }
  0x82   : > { %1593 = vmatpush3.msra.mxu0 %v310_v1  ;;  %vm402_vm3 = vcmp.eq.s32.totalorder %v398_v23, %v401_v24  ;;  %v399_v26 = vadd.s32 8, %v398_v23  ;;  %s1988_s9 = smov 48   ;;  %s1989_s28 = smov 72   ;;  %vm1270_vm7 = vcmask 261312  }
  0x83   : > { %1594 = vmatprep.subr.mxu0 %v309_v3  ;;  %v2244_v27 = vsel %vm402_vm3, 1.0, %v1511_v25  ;;  %s1990_s10 = smov 104   ;;  %s1991_s12 = smov 40  }
  0x84   : > { %1595 = vmatpush3.msra.mxu0 %v309_v3  ;;  %vm403_vm4 = vcmp.eq.s32.totalorder %v399_v26, %v401_v24  ;;  %s1992_s17 = smov 8   ;;  %s1993_s3 = smov 16  }
  0x85   : > { %1596 = vmatprep.subr.mxu0 %v308_v4  ;;  %v2247_v30 = vsel %vm403_vm4, 1.0, %v1511_v25  ;;  %s1994_s6 = smov 24   ;;  %s305_s26 = scalar_lea.vmem [#allocation11], %s1505_s27 }
  0x86   : > { %1597 = vmatpush3.msra.mxu0 %v308_v4  ;;  %s1383_s13 = sshll.u32 %s305_s26, 4  ;;  %s1370_s27 = scalar_lea.sflag [#allocation5], %s2194_s2  ;;  %s2340_s13 = int_to_ptr.vmem [resolvable:$true] %s1383_s13 }
  0x87   : > { %1599 = vmatmul.mubr.msk.f32.vlgmr.msra.gmra.mxu0 %vm312_vm0, %v307_v5  ;;  %p2422_p10 = scmp.ne.s32.totalorder %s2410_s23, 0 }
 0x147   : > { %v2220_v6 = vpop.f32.mrf.mxu0 }
 0x148   : > { %416 = vrot.lane.b32.xlu0 %v2220_v6, %s1981_s24  ;;  %v2236_v11 = vmul.f32 0.35355338, %v2220_v6 }
 0x149   : > { %v2223_v7 = vpop.f32.mrf.mxu0 }
 0x14a   : > { %v2226_v8 = vmul.f32 0.35355338, %v2223_v7 }
 0x14c   : > { %414 = vrot.lane.b32.xlu0 %v2223_v7, %s1981_s24  ;;  %1605 = vmatprep.mubr.msk.f32.mxu1 %vm418_vm1, %v2226_v8  ;;  %s1545_s24 = sshll.u32 %s2048_s22, 8  ;;  %s1995_s22 = smov [#allocation11]  }
 0x1ba   : > { %v417_v9 = vpop.permute.xlu0 %416 }
 0x1bb   : > { %1601 = vmatprep.subr.msk.mxu1 %vm418_vm1, %v417_v9 }
 0x1bc   : > { %1602 = vmatpush3.xpose.msk.msra.mxu1 %vm418_vm1, %v417_v9 }
 0x1be   : > { %v415_v10 = vpop.permute.xlu0 %414 }
 0x1bf   : > { %1603 = vmatprep.subr.msk.mxu1 %vm418_vm1, %v415_v10 }
 0x1c0   : > { %1604 = vmatpush3.xpose.msk.msra.mxu1 %vm418_vm1, %v415_v10 }
 0x1c3   : > { %1606 = vmatmul.mubr.msk.f32.vlgmr.msra.gmra.mxu1 %vm418_vm1, %v2236_v11 }
 0x283   : > { %v1607_v12 = vpop.f32.mrf.mxu1 }
 0x284   : > { %v508_v15 = vsel %vm504_vm2, %v1607_v12, -inf }
 0x285   : > { %v495_v13 = vpop.f32.mrf.mxu1 }
 0x286   : > { %v505_v14 = vsel %vm504_vm2, %v495_v13, -inf }
 0x287   : > { %506 = vmax.xlane.f32.xlu1 %v505_v14 }
 0x28b   : > { %509 = vmax.xlane.f32.xlu1 %v508_v15 }
 0x310   : > { %v507_v16 = vpop.xlane.xlu1 %506 }
 0x311   : > { %v511_v17 = vsub.f32 %v495_v13, %v507_v16 }
 0x313   : > { %v513_v18 = vmul.f32 1.442695, %v511_v17 }
 0x314   : > { %v510_v19 = vpop.xlane.xlu1 %509 }
 0x315   : > { %1757 = vpow2.f32 %v513_v18  ;;  %v512_v20 = vsub.f32 %v1607_v12, %v510_v19 }
 0x317   : > { %v515_v22 = vmul.f32 1.442695, %v512_v20 }
 0x319   : > { %1759 = vpow2.f32 %v515_v22 }
 0x322   : > { %v1758_v28 = vpop.eup %1757 }
 0x323   : > { %v517_v29 = vmul.f32 %v1758_v28, %v2244_v27 }
 0x325   : > { %v519_v31 = vsel %vm504_vm2, %v517_v29, 0.0  ;;  %v529_v41 = vadd.f32 6.25e-08, %v517_v29 }
 0x326   : > { %v1760_v32 = vpop.eup %1759  ;;  %520 = vadd.xlane.f32.xlu0 %v519_v31 }
 0x327   : > { %v518_v33 = vmul.f32 %v1760_v32, %v2247_v30 }
 0x329   : > { %v522_v34 = vsel %vm504_vm2, %v518_v33, 0.0  ;;  %v530_v45 = vadd.f32 6.25e-08, %v518_v33 }
 0x32a   : > { %523 = vadd.xlane.f32.xlu1 %v522_v34 }
 0x33b   : > { %535 = vrot.lane.b32.xlu1 %v2220_v6, %s1982_s14 }
 0x33c   : > { %622 = vrot.lane.b32.xlu0 %v2226_v8, %s1983_s16 }
 0x33f   : > { %533 = vrot.lane.b32.xlu1 %v2223_v7, %s1982_s14 }
 0x343   : > { %628 = vrot.lane.b32.xlu1 %v2220_v6, %s1984_s11 }
 0x347   : > { %626 = vrot.lane.b32.xlu1 %v2223_v7, %s1984_s11  ;;  %s2346_s11 = scalar_lea.hbm %s2396_s5, %s1545_s24 }
 0x34b   : > { %624 = vrot.lane.b32.xlu1 %v2236_v11, %s1983_s16 }
 0x3af   : > { %v521_v35 = vpop.xlane.xlu0 %520 }
 0x3b0   : > { %v525_v36 = vadd.f32 1e-06, %v521_v35 }
 0x3b2   : > { %1761 = vrcp.f32 %v525_v36 }
 0x3b3   : > { %v524_v37 = vpop.xlane.xlu1 %523  ;;  %v623_v48 = vpop.permute.xlu0 %622 }
 0x3b4   : > { %v526_v38 = vadd.f32 1e-06, %v524_v37 }
 0x3b6   : > { %1763 = vrcp.f32 %v526_v38 }
 0x3b7   : > { %v536_v39 = vpop.permute.xlu1 %535 }
 0x3b8   : > { %1608 = vmatprep.subr.mxu1 %v536_v39 }
 0x3b9   : > { %1609 = vmatpush3.msra.mxu1 %v536_v39 }
 0x3bb   : > { %v534_v40 = vpop.permute.xlu1 %533 }
 0x3bc   : > { %1610 = vmatprep.subr.mxu1 %v534_v40 }
 0x3bd   : > { %1611 = vmatpush3.msra.mxu1 %v534_v40 }
 0x3bf   : > { %v1762_v42 = vpop.eup %1761  ;;  %v629_v43 = vpop.permute.xlu1 %628 }
 0x3c0   : > { %1615 = vmatprep.subr.msk.mxu1 %vm418_vm1, %v629_v43  ;;  %v531_v44 = vmul.f32 %v1762_v42, %v529_v41 }
 0x3c2   : > { %1612 = vmatprep.mubr.msk.f32.mxu1 %vm504_vm2, %v531_v44 }
 0x3c3   : > { %v1764_v46 = vpop.eup %1763  ;;  %v627_v49 = vpop.permute.xlu1 %626 }
 0x3c4   : > { %v532_v47 = vmul.f32 %v1764_v46, %v530_v45 }
 0x3c6   : > { %1613 = vmatmul.mubr.msk.f32.vlgmr.msra.gmra.mxu1 %vm504_vm2, %v532_v47 }
 0x3c7   : > { %1616 = vmatpush3.xpose.msk.msra.mxu1 %vm418_vm1, %v629_v43  ;;  %1619 = vmatprep.mubr.msk.f32.mxu1 %vm418_vm1, %v623_v48  ;;  %v625_v50 = vpop.permute.xlu1 %624 }
 0x3c8   : > { %1617 = vmatprep.subr.msk.mxu1 %vm418_vm1, %v627_v49 }
 0x3cb   : > { %1618 = vmatpush3.xpose.msk.msra.mxu1 %vm418_vm1, %v627_v49 }
 0x3ce   : > { %1620 = vmatmul.mubr.msk.f32.vlgmr.msra.gmra.mxu1 %vm418_vm1, %v625_v50 }
 0x486   : > { %v1614_v51 = vpop.f32.mrf.mxu1 }
 0x487   : > { %621 = vst.msk [vmem:[#allocation2 + $0x8] sm:$0xff] %vm418_vm1, %v1614_v51 }
 0x488   : > { %v611_v52 = vpop.f32.mrf.mxu1 }
 0x489   : > { %620 = vst.msk [vmem:[#allocation2] sm:$0xff] %vm418_vm1, %v611_v52 }
 0x48e   : > { %v1621_v53 = vpop.f32.mrf.mxu1 }
 0x48f   : > { %v716_v54 = vsel %vm504_vm2, %v1621_v53, -inf }
 0x490   : > { %717 = vmax.xlane.f32.xlu0 %v716_v54  ;;  %v704_v55 = vpop.f32.mrf.mxu1 }
 0x491   : > { %v713_v56 = vsel %vm504_vm2, %v704_v55, -inf }
 0x492   : > { %714 = vmax.xlane.f32.xlu1 %v713_v56 }
 0x4a3   : > { %743 = vrot.lane.b32.xlu1 %v2220_v6, %s1985_s29 }
 0x4a6   : > { %741 = vrot.lane.b32.xlu0 %v2223_v7, %s1985_s29  ;;  %s1897_s29 = scalar_lea.vmem %s2340_s13, 256 }
 0x4a7   : > { %845 = vrot.lane.b32.xlu1 %v2220_v6, %s1986_s30  ;;  %p1898_p0 = scmp.ne.s32.totalorder %s2340_s13, %s1897_s29 }
 0x4a9   : > { %p1899_p3 = pnand %p1898_p0, %p2422_p10 }
 0x4aa   : > { %839 = vrot.lane.b32.xlu0 %v2226_v8, %s1987_s8 }
 0x4ab   : > { %p1900_p11 = pneg %p1899_p3 }
 0x519   : > { %v718_v57 = vpop.xlane.xlu0 %717 }
 0x51a   : > { %v720_v58 = vsub.f32 %v1621_v53, %v718_v57 }
 0x51b   : > { %v715_v59 = vpop.xlane.xlu1 %714 }
 0x51c   : > { %v723_v60 = vmul.f32 1.442695, %v720_v58  ;;  %v719_v61 = vsub.f32 %v704_v55, %v715_v59 }
 0x51d   : > { %v742_v0 = vpop.permute.xlu0 %741 }
 0x51e   : > { %1765 = vpow2.f32 %v723_v60  ;;  %v721_v62 = vmul.f32 1.442695, %v719_v61 }
 0x51f   : > { %v744_v63 = vpop.permute.xlu1 %743 }
 0x520   : > { %1767 = vpow2.f32 %v721_v62  ;;  %1622 = vmatprep.subr.mxu0 %v744_v63 }
 0x521   : > { %1623 = vmatpush3.msra.mxu0 %v744_v63  ;;  %v840_v22 = vpop.permute.xlu0 %839 }
 0x522   : > { %1624 = vmatprep.subr.mxu0 %v742_v0 }
 0x523   : > { %1625 = vmatpush3.msra.mxu0 %v742_v0  ;;  %v846_v1 = vpop.permute.xlu1 %845 }
 0x524   : > { %1629 = vmatprep.subr.msk.mxu0 %vm418_vm1, %v846_v1 }
 0x52b   : > { %v1766_v2 = vpop.eup %1765 }
 0x52c   : > { %v726_v3 = vmul.f32 %v1766_v2, %v2247_v30 }
 0x52d   : > { %v1768_v4 = vpop.eup %1767 }
 0x52e   : > { %v730_v5 = vsel %vm504_vm2, %v726_v3, 0.0  ;;  %v725_v9 = vmul.f32 %v1768_v4, %v2244_v27  ;;  %v738_v19 = vadd.f32 6.25e-08, %v726_v3 }
 0x52f   : > { %731 = vadd.xlane.f32.xlu1 %v730_v5 }
 0x530   : > { %v727_v10 = vsel %vm504_vm2, %v725_v9, 0.0  ;;  %v737_v17 = vadd.f32 6.25e-08, %v725_v9 }
 0x533   : > { %728 = vadd.xlane.f32.xlu1 %v727_v10 }
 0x544   : > { %843 = vrot.lane.b32.xlu1 %v2223_v7, %s1986_s30  ;;  %s1901_s30 = sshll.u32 %s1995_s22, 4  ;;  %s1902_s30 = int_to_ptr.vmem [resolvable:$false] %s1901_s30 }
 0x545   : > { %p1904_p9 = scmp.lt.s32.totalorder %s2340_s13, %s1902_s30 }
 0x548   : > { %841 = vrot.lane.b32.xlu1 %v2236_v11, %s1987_s8  ;;  %s1903_s8 = scalar_lea.vmem %s1902_s30, 512 }
 0x549   : > { %p1905_p13 = scmp.lt.s32.totalorder %s1903_s8, %s1897_s29 }
 0x54b   : > { %p1906_p1 = por %p1905_p13, %p1904_p9 }
 0x54d   : > { %p1907_p4 = pnand %p1906_p1, %p1900_p11 }
 0x5b8   : > { %v732_v12 = vpop.xlane.xlu1 %731 }
 0x5b9   : > { %v734_v13 = vadd.f32 1e-06, %v732_v12 }
 0x5bb   : > { %1769 = vrcp.f32 %v734_v13 }
 0x5bc   : > { %v729_v14 = vpop.xlane.xlu1 %728 }
 0x5bd   : > { %v733_v15 = vadd.f32 1e-06, %v729_v14 }
 0x5bf   : > { %1771 = vrcp.f32 %v733_v15 }
 0x5c0   : > { %v844_v23 = vpop.permute.xlu1 %843 }
 0x5c4   : > { %v842_v24 = vpop.permute.xlu1 %841 }
 0x5c8   : > { %v1770_v16 = vpop.eup %1769 }
 0x5c9   : > { %v740_v21 = vmul.f32 %v1770_v16, %v738_v19 }
 0x5cc   : > { %v1772_v18 = vpop.eup %1771 }
 0x5cd   : > { %v739_v20 = vmul.f32 %v1772_v18, %v737_v17 }
 0x5cf   : > { %1626 = vmatprep.mubr.msk.f32.mxu0 %vm504_vm2, %v739_v20 }
 0x5d0   : > { %1627 = vmatmul.mubr.msk.f32.vlgmr.msra.gmra.mxu0 %vm504_vm2, %v740_v21 }
 0x5d1   : > { %1630 = vmatpush3.xpose.msk.msra.mxu0 %vm418_vm1, %v846_v1  ;;  %1633 = vmatprep.mubr.msk.f32.mxu0 %vm418_vm1, %v840_v22 }
 0x5d2   : > { %1631 = vmatprep.subr.msk.mxu0 %vm418_vm1, %v844_v23 }
 0x5d5   : > { %1632 = vmatpush3.xpose.msk.msra.mxu0 %vm418_vm1, %v844_v23 }
 0x5d8   : > { %1634 = vmatmul.mubr.msk.f32.vlgmr.msra.gmra.mxu0 %vm418_vm1, %v842_v24 }
 0x690   : > { %v2288_v25 = vpop.f32.mrf.mxu0 }
 0x692   : > { %v2290_v26 = vpop.f32.mrf.mxu0 }
 0x698   : > { %v1635_v28 = vpop.f32.mrf.mxu0 }
 0x699   : > { %v933_v29 = vsel %vm504_vm2, %v1635_v28, -inf }
 0x69a   : > { %934 = vmax.xlane.f32.xlu1 %v933_v29  ;;  %v921_v31 = vpop.f32.mrf.mxu0 }
 0x69b   : > { %v930_v32 = vsel %vm504_vm2, %v921_v31, -inf }
 0x69c   : > { %931 = vmax.xlane.f32.xlu0 %v930_v32  ;;  %v1277_v32 = vld [vmem:[#allocation9 + $0x10] sm:$0xff] }
 0x6ab   : > { %960 = vrot.lane.b32.xlu1 %v2220_v6, %s1988_s9 }
 0x6af   : > { %1062 = vrot.lane.b32.xlu1 %v2220_v6, %s1989_s28 }
 0x6b3   : > { %1060 = vrot.lane.b32.xlu1 %v2223_v7, %s1989_s28 }
 0x6b7   : > { %1058 = vrot.lane.b32.xlu1 %v2236_v11, %s1990_s10 }
 0x723   : > { %v935_v33 = vpop.xlane.xlu1 %934 }
 0x724   : > { %v937_v34 = vsub.f32 %v1635_v28, %v935_v33  ;;  %v1276_v33 = vld [vmem:[#allocation9 + $0x8] sm:$0xff] }
 0x725   : > { %v932_v35 = vpop.xlane.xlu0 %931 }
 0x726   : > { %v940_v36 = vmul.f32 1.442695, %v937_v34  ;;  %v936_v37 = vsub.f32 %v921_v31, %v932_v35  ;;  %v1278_v31 = vld [vmem:[#allocation9 + $0x18] sm:$0xff]  ;;  %v1275_v34 = vld [vmem:[#allocation9] sm:$0xff] }
 0x727   : > { %v961_v38 = vpop.permute.xlu1 %960 }
 0x728   : > { %1773 = vpow2.f32 %v940_v36  ;;  %v938_v39 = vmul.f32 1.442695, %v936_v37  ;;  %1636 = vmatprep.subr.mxu1 %v961_v38 }
 0x729   : > { %1637 = vmatpush3.msra.mxu1 %v961_v38 }
 0x72a   : > { %1775 = vpow2.f32 %v938_v39 }
 0x72b   : > { %v1063_v50 = vpop.permute.xlu1 %1062 }
 0x72f   : > { %v1061_v57 = vpop.permute.xlu1 %1060 }
 0x733   : > { %v1059_v58 = vpop.permute.xlu1 %1058 }
 0x735   : > { %v1774_v40 = vpop.eup %1773 }
 0x736   : > { %v943_v41 = vmul.f32 %v1774_v40, %v2247_v30 }
 0x737   : > { %v1776_v42 = vpop.eup %1775 }
 0x738   : > { %v947_v43 = vsel %vm504_vm2, %v943_v41, 0.0  ;;  %v942_v44 = vmul.f32 %v1776_v42, %v2244_v27  ;;  %v955_v54 = vadd.f32 6.25e-08, %v943_v41  ;;  %v1536_v41 = vld [vmem:[%s2395_s4] ss:$0 sm:$0xff] }
 0x739   : > { %948 = vadd.xlane.f32.xlu0 %v947_v43 }
 0x73a   : > { %v944_v11 = vsel %vm504_vm2, %v942_v44, 0.0  ;;  %v954_v52 = vadd.f32 6.25e-08, %v942_v44 }
 0x73d   : > { %945 = vadd.xlane.f32.xlu0 %v944_v11 }
 0x753   : > { %958 = vrot.lane.b32.xlu0 %v2223_v7, %s1988_s9 }
 0x757   : > { %1056 = vrot.lane.b32.xlu0 %v2226_v8, %s1990_s10 }
 0x7c2   : > { %v949_v45 = vpop.xlane.xlu0 %948 }
 0x7c3   : > { %v951_v46 = vadd.f32 1e-06, %v949_v45 }
 0x7c5   : > { %1777 = vrcp.f32 %v951_v46 }
 0x7c6   : > { %v946_v47 = vpop.xlane.xlu0 %945 }
 0x7c7   : > { %v950_v48 = vadd.f32 1e-06, %v946_v47 }
 0x7c9   : > { %1779 = vrcp.f32 %v950_v48 }
 0x7ca   : > { %v959_v49 = vpop.permute.xlu0 %958 }
 0x7cb   : > { %1638 = vmatprep.subr.mxu1 %v959_v49 }
 0x7cc   : > { %1639 = vmatpush3.msra.mxu1 %v959_v49 }
 0x7cd   : > { %1643 = vmatprep.subr.msk.mxu1 %vm418_vm1, %v1063_v50 }
 0x7ce   : > { %v1057_v8 = vpop.permute.xlu0 %1056 }
 0x7d2   : > { %v1778_v51 = vpop.eup %1777 }
 0x7d3   : > { %v957_v56 = vmul.f32 %v1778_v51, %v955_v54 }
 0x7d6   : > { %v1780_v53 = vpop.eup %1779 }
 0x7d7   : > { %v956_v55 = vmul.f32 %v1780_v53, %v954_v52 }
 0x7d9   : > { %1640 = vmatprep.mubr.msk.f32.mxu1 %vm504_vm2, %v956_v55 }
 0x7da   : > { %1641 = vmatmul.mubr.msk.f32.vlgmr.msra.gmra.mxu1 %vm504_vm2, %v957_v56 }
 0x7db   : > { %1644 = vmatpush3.xpose.msk.msra.mxu1 %vm418_vm1, %v1063_v50  ;;  %1647 = vmatprep.mubr.msk.f32.mxu1 %vm418_vm1, %v1057_v8 }
 0x7dc   : > { %1645 = vmatprep.subr.msk.mxu1 %vm418_vm1, %v1061_v57 }
 0x7df   : > { %1646 = vmatpush3.xpose.msk.msra.mxu1 %vm418_vm1, %v1061_v57 }
 0x7e2   : > { %1648 = vmatmul.mubr.msk.f32.vlgmr.msra.gmra.mxu1 %vm418_vm1, %v1059_v58 }
 0x89a   : > { %v1642_v59 = vpop.f32.mrf.mxu1 }
 0x89c   : > { %v1036_v60 = vpop.f32.mrf.mxu1 }
 0x8a2   : > { %v1649_v61 = vpop.f32.mrf.mxu1 }
 0x8a3   : > { %v1150_v62 = vsel %vm504_vm2, %v1649_v61, -inf }
 0x8a4   : > { %1151 = vmax.xlane.f32.xlu1 %v1150_v62  ;;  %v1138_v63 = vpop.f32.mrf.mxu1 }
 0x8a5   : > { %v1147_v0 = vsel %vm504_vm2, %v1138_v63, -inf }
 0x8a6   : > { %1148 = vmax.xlane.f32.xlu0 %v1147_v0 }
 0x8b5   : > { %1177 = vrot.lane.b32.xlu1 %v2220_v6, %s1991_s12 }
 0x8b9   : > { %830 = vrot.lane.b32.xlu1 %v2290_v26, %s1992_s17 }
 0x8bd   : > { %832 = vrot.lane.b32.xlu1 %v2288_v25, %s1992_s17 }
 0x8c1   : > { %1049 = vrot.lane.b32.xlu1 %v1642_v59, %s1993_s3 }
 0x92d   : > { %v1152_v1 = vpop.xlane.xlu1 %1151 }
 0x92e   : > { %v1154_v2 = vsub.f32 %v1649_v61, %v1152_v1 }
 0x92f   : > { %v1149_v3 = vpop.xlane.xlu0 %1148 }
 0x930   : > { %v1157_v4 = vmul.f32 1.442695, %v1154_v2  ;;  %v1153_v5 = vsub.f32 %v1138_v63, %v1149_v3 }
 0x931   : > { %v1178_v9 = vpop.permute.xlu1 %1177 }
 0x932   : > { %1781 = vpow2.f32 %v1157_v4  ;;  %v1155_v10 = vmul.f32 1.442695, %v1153_v5  ;;  %1650 = vmatprep.subr.mxu0 %v1178_v9 }
 0x933   : > { %1651 = vmatpush3.msra.mxu0 %v1178_v9 }
 0x934   : > { %1783 = vpow2.f32 %v1155_v10 }
 0x935   : > { %v831_v6 = vpop.permute.xlu1 %830 }
 0x936   : > { %837 = vst.msk [vmem:[#allocation2] sm:$0xff] %vm836_vm5, %v831_v6 }
 0x939   : > { %v833_v12 = vpop.permute.xlu1 %832 }
 0x93a   : > { %838 = vst.msk [vmem:[#allocation2 + $0x8] sm:$0xff] %vm836_vm5, %v833_v12 }
 0x93d   : > { %v1050_v13 = vpop.permute.xlu1 %1049 }
 0x93e   : > { %1055 = vst.msk [vmem:[#allocation2 + $0x8] sm:$0xff] %vm1053_vm6, %v1050_v13 }
 0x93f   : > { %v1782_v14 = vpop.eup %1781 }
 0x940   : > { %v1160_v15 = vmul.f32 %v1782_v14, %v2247_v30 }
 0x941   : > { %v1784_v16 = vpop.eup %1783 }
 0x942   : > { %v1164_v17 = vsel %vm504_vm2, %v1160_v15, 0.0  ;;  %v1159_v18 = vmul.f32 %v1784_v16, %v2244_v27  ;;  %v1172_v28 = vadd.f32 6.25e-08, %v1160_v15 }
 0x943   : > { %1165 = vadd.xlane.f32.xlu0 %v1164_v17 }
 0x944   : > { %v1161_v19 = vsel %vm504_vm2, %v1159_v18, 0.0  ;;  %v1171_v25 = vadd.f32 6.25e-08, %v1159_v18 }
 0x947   : > { %1162 = vadd.xlane.f32.xlu0 %v1161_v19 }
 0x95d   : > { %1175 = vrot.lane.b32.xlu0 %v2223_v7, %s1991_s12 }
 0x961   : > { %1047 = vrot.lane.b32.xlu0 %v1036_v60, %s1993_s3 }
 0x9cc   : > { %v1166_v20 = vpop.xlane.xlu0 %1165 }
 0x9cd   : > { %v1168_v21 = vadd.f32 1e-06, %v1166_v20 }
 0x9cf   : > { %1785 = vrcp.f32 %v1168_v21 }
 0x9d0   : > { %v1163_v22 = vpop.xlane.xlu0 %1162 }
 0x9d1   : > { %v1167_v23 = vadd.f32 1e-06, %v1163_v22 }
 0x9d3   : > { %1787 = vrcp.f32 %v1167_v23 }
 0x9d4   : > { %v1176_v30 = vpop.permute.xlu0 %1175 }
 0x9d5   : > { %1652 = vmatprep.subr.mxu0 %v1176_v30 }
 0x9d6   : > { %1653 = vmatpush3.msra.mxu0 %v1176_v30 }
 0x9d7   : > { %1657 = vmatprep.subr.mxu0 %v1278_v31 }
 0x9d8   : > { %v1048_v24 = vpop.permute.xlu0 %1047 }
 0x9d9   : > { %1054 = vst.msk [vmem:[#allocation2] sm:$0xff] %vm1053_vm6, %v1048_v24 }
 0x9dc   : > { %v1786_v27 = vpop.eup %1785 }
 0x9dd   : > { %v1174_v7 = vmul.f32 %v1786_v27, %v1172_v28 }
 0x9e0   : > { %v1788_v26 = vpop.eup %1787 }
 0x9e1   : > { %v1173_v29 = vmul.f32 %v1788_v26, %v1171_v25 }
 0x9e3   : > { %1654 = vmatprep.mubr.msk.f32.mxu0 %vm504_vm2, %v1173_v29 }
 0x9e4   : > { %1655 = vmatmul.mubr.msk.f32.vlgmr.msra.gmra.mxu0 %vm504_vm2, %v1174_v7 }
 0x9e5   : > { %1658 = vmatpush3.msra.mxu0 %v1278_v31 }
 0x9e6   : > { %1659 = vmatprep.subr.mxu0 %v1277_v32 }
 0x9e7   : > { %1660 = vmatpush3.msra.mxu0 %v1277_v32 }
 0x9e8   : > { %1661 = vmatprep.subr.mxu0 %v1276_v33 }
 0x9e9   : > { %1662 = vmatpush3.msra.mxu0 %v1276_v33 }
 0x9ea   : > { %1663 = vmatprep.subr.mxu0 %v1275_v34 }
 0x9eb   : > { %1664 = vmatpush3.msra.mxu0 %v1275_v34 }
 0xaa4   : > { %v1656_v35 = vpop.f32.mrf.mxu0 }
 0xaa5   : > { %1266 = vrot.lane.b32.xlu1 %v1656_v35, %s1994_s6 }
 0xaa6   : > { %v1253_v36 = vpop.f32.mrf.mxu0 }
 0xaa7   : > { %1264 = vrot.lane.b32.xlu0 %v1253_v36, %s1994_s6 }
 0xb17   : > { %v1267_v37 = vpop.permute.xlu1 %1266 }
 0xb18   : > { %1272 = vst.msk [vmem:[#allocation2 + $0x8] sm:$0xff] %vm1270_vm7, %v1267_v37 }
 0xb19   : > { %v1265_v38 = vpop.permute.xlu0 %1264 }
 0xb1a   : > { %1271 = vst.msk [vmem:[#allocation2] sm:$0xff] %vm1270_vm7, %v1265_v38 }
 0xb1f   : > { %v1274_v40 = vld [vmem:[#allocation2 + $0x8] sm:$0xff] }
 0xb21   : > { %v1273_v39 = vld [vmem:[#allocation2] sm:$0xff] }
 0xb22   : > { %1665 = vmatprep.mubr.msk.f32.mxu0 %vm312_vm0, %v1273_v39 }
 0xb23   : > { %1666 = vmatmul.mubr.msk.f32.vlgmr.msra.gmra.mxu0 %vm312_vm0, %v1274_v40 }
 0xbe3   : > { %v1667_v42 = vpop.f32.mrf.mxu0 }
 0xbe4   : > { %v1364_v43 = vadd.f32 %v1667_v42, %v1536_v41 }
 0xbe5   : > { %v1358_v44 = vpop.f32.mrf.mxu0 }
 0xbe6   : > { %1368 = vst.msk [vmem:[%s305_s26 + $0x8] sm:$0xff] %vm312_vm0, %v1364_v43  ;;  %v1359_v11 = vadd.f32 %v1536_v41, %v1358_v44 }
 0xbe8   : > { %1367 = vst.msk [vmem:[%s305_s26] sm:$0xff] %vm312_vm0, %v1359_v11 }
 0xbe9   : > { %1910 = shalt.err (!%p1907_p4)
}
 0xbea   : > { %s1911_s9 = scalar_lea.hbm %s2346_s11, 256  ;;  %s1915_s12 = scalar_lea.hbm %s2396_s5, 512 }
 0xbeb   : > { %p1912_p6 = scmp.ne.s32.totalorder %s2346_s11, %s1911_s9  ;;  %p1916_p2 = scmp.lt.s32.totalorder %s2346_s11, %s2396_s5 }
 0xbec   : > { %p1917_p5 = scmp.lt.s32.totalorder %s1915_s12, %s1911_s9 }
 0xbed   : > { %p1913_p7 = pnand %p1912_p6, %p2422_p10 }
 0xbee   : > { %p1918_p12 = por %p1917_p5, %p1916_p2 }
 0xbef   : > { %p1914_p8 = pneg %p1913_p7 }
 0xbf1   : > { %p1919_p0 = pnand %p1918_p12, %p1914_p8 }
 0xbf3   : > { %1922 = shalt.err (!%p1919_p0)
}
 0xbf4   : > { %s1996_s7 = smov 128  }
 0xbf5   : > { %1680 = dma.vmem_to_hbm [thread:$0]  (%p2422_p10), %s2340_s13, 256, %s2346_s11, %s1370_s27, %s1996_s7, %s1996_s7, %s1992_s17  }
 0xbf6 PF: > { %s1398_s0 = sand.u32 1, %s1961_s18   ;;  %p2423_p3 = scmp.ne.s32.totalorder %s2405_s25, 0 }
 0xbf7   : > { %p2424_p11 = scmp.ge.s32.totalorder %s1973_s21, 2  ;;  %s1399_s26 = scalar_lea.sflag [#allocation5], %s1398_s0 }
 0xbf9   : > { %p1697_p9 = pnand %p2424_p11, %p2423_p3 }
 0xbfb   : > { %p1698_p13 = pneg %p1697_p9 }
 0xbfd   : > { %1956 = dma.done.wait (%p1698_p13), %s1399_s26, 256  }
 0xbfe   : > { %1958 = vsyncadd (%p1698_p13), %s1399_s26, 4294967040  ;;  %s2425_s23 = sld [smem:[#allocation17_spill]]  ;;  %p22_p1 = scmp.ge.s32.totalorder %s2105_s15, 4  }
 0xbff   : > { %s2426_s18 = smov %s1965_s19  ;;  %s2427_s19 = smov %s1969_s20 }
 0xc00   : > { %s2429_s21 = smov %s2105_s15  ;;  %24 = sbr.rel (!%p22_p1) target bundleno = 12 (0xc), region = 106 }
 0xc04   : > { %s2428_s20 = smov %s2425_s23 }
 0xc05   :  { %1404 = vsyncpa [#allocation4], 1 }
 0xc06   :  { %1406 = vsyncpa [#allocation4 + $0x1], 1 }
 0xc07   :  { %1407 = vsyncpa [#allocation7], 1 }
 0xc08   :  { %1409 = vsyncpa [#allocation7 + $0x1], 1 }
 0xc09   :  { %1410 = vsyncpa [#allocation10], 1 }
 0xc0a   :  { %1411 = vsyncpa [#allocation5], 1 }
 0xc0b   :  { %1413 = vsyncpa [#allocation5 + $0x1], 1 }

// kernel: tpu_custom_call.1
= control target key start
LH: loop header
LB: loop body
LE: loop exit
PB: predicated region body
PF: predicated region fallthrough
CT: control target
= control target key end

     0   :  { %s2391_s0 = inlined_call_operand.hbm [shape: f32[2,16,32], index: 0, kind: input, shape index: {}]   ;;  %s2392_s1 = inlined_call_operand.hbm [shape: f32[2,1,16], index: 1, kind: input, shape index: {}]   ;;  %s2393_s2 = inlined_call_operand.hbm [shape: f32[32,96], index: 2, kind: input, shape index: {}]   ;;  %s2394_s3 = inlined_call_operand.hbm [shape: f32[32,32], index: 3, kind: input, shape index: {}]   ;;  %s2395_s4 = inlined_call_operand.vmem [shape: f32[1,32], index: 4, kind: input, shape index: {}]   ;;  %s2396_s5 = inlined_call_operand.hbm [shape: f32[2,16,32], index: 5, kind: output, shape index: {}]  }
   0x1   :  { %2401 = sst [smem:[#allocation18_spill]] %s2391_s0 }
   0x2   :  { %2402 = sst [smem:[#allocation19_spill]] %s2393_s2 }
   0x3   :  { %2403 = sst [smem:[#allocation20_spill]] %s2394_s3 }
   0x4   :  { %10 = vsyncpa [#allocation4], 0 }
   0x5   :  { %12 = vsyncpa [#allocation4 + $0x1], 0 }
   0x6   :  { %13 = vsyncpa [#allocation7], 0 }
   0x7   :  { %15 = vsyncpa [#allocation7 + $0x1], 0 }
   0x8   :  { %16 = vsyncpa [#allocation10], 0 }
   0x9   :  { %17 = vsyncpa [#allocation5], 0 }
   0xa   :  { %19 = vsyncpa [#allocation5 + $0x1], 0  ;;  %s2027_s18 = smov 0   ;;  %s2029_s19 = smov 0  }
   0xb   :  { %s2031_s20 = smov 0   ;;  %s2033_s21 = smov 0  }
   0xc LB: > { %s2048_s22 = sadd.s32 4294967295, %s1973_s21   ;;  %s1495_s23 = sadd.s32 4294967294, %s1973_s21   ;;  %s1973_s21 = sphi %s2033_s21, %s2429_s21   ;;  %s1969_s20 = sphi %s2031_s20, %s2428_s20   ;;  %s1965_s19 = sphi %s2029_s19, %s2427_s19   ;;  %s1961_s18 = sphi %s2027_s18, %s2426_s18  }
   0xd   : > { %p45_p0 = scmp.ne.s32.totalorder %s1965_s19, %s1961_s18  ;;  %p2397_p1 = scmp.eq.s32.totalorder %s2048_s22, 0 }
   0xe   : > { %p158_p2 = scmp.eq.s32.totalorder %s2048_s22, 1  ;;  %p164_p3 = scmp.eq.s32.totalorder %s1495_s23, 1 }
   0xf   : > { %p2057_p4 = por %p2397_p1, %p45_p0  ;;  %p1496_p5 = scmp.ge.s32.totalorder %s1973_s21, 1 }
  0x10   : > { %p2062_p6 = por %p164_p3, %p45_p0  ;;  %p171_p7 = scmp.lt.s32.totalorder %s1973_s21, 3 }
  0x11   : > { %s2404_s24 = scalar_select %p2057_p4, 1, 0 }
  0x12   : > { %s2405_s25 = scalar_select %p2062_p6, 1, 0 }
  0x13   : > { %p2067_p8 = pnand %p1496_p5, %p171_p7  ;;  %s1975_s27 = smov [#allocation8]  }
  0x14   : > { %s183_s28 = sshll.u32 %s1975_s27, 4  ;;  %s1976_s30 = smov [#allocation9]   ;;  %s184_s28 = int_to_ptr.vmem [resolvable:$true] %s183_s28 }
  0x15   : > { %s2406_s26 = scalar_select %p2067_p8, 1, 0 }
  0x16   : > { %p1682_p9 = pneg %p2067_p8  ;;  %s196_s6 = sshll.u32 %s1976_s30, 4  ;;  %s197_s6 = int_to_ptr.vmem [resolvable:$true] %s196_s6 }
  0x17   : > { %s1800_s7 = scalar_lea.vmem %s184_s28, 512  ;;  %p1808_p5 = scmp.lt.s32.totalorder %s184_s28, %s184_s28 }
  0x18   : > { %p2076_p11 = pnand %p1682_p9, %p2397_p1  ;;  %p1801_p13 = scmp.ne.s32.totalorder %s184_s28, %s1800_s7 }
  0x19   : > { %p1809_p7 = scmp.lt.s32.totalorder %s1800_s7, %s1800_s7 }
  0x1a   : > { %p1791_p12 = pneg %p2076_p11 }
  0x1b   : > { %p1810_p10 = por %p1809_p7, %p1808_p5 }
  0x1c   : > { %p1803_p0 = pnand %p1801_p13, %p1791_p12 }
  0x1e   : > { %p1804_p3 = pneg %p1803_p0 }
  0x20   : > { %p1811_p9 = pnand %p1810_p10, %p1804_p3 }
  0x22   : > { %1814 = shalt.err (!%p1811_p9)
}
  0x23   : > { %s1977_s8 = smov 128   ;;  %s1978_s9 = smov 8  }
  0x24   : > { %s2408_s2 = sld [smem:[#allocation19_spill]]  ;;  %s1826_s12 = scalar_lea.vmem %s197_s6, 512 }
  0x25   : > { %p1827_p13 = scmp.ne.s32.totalorder %s197_s6, %s1826_s12  ;;  %p1834_p10 = scmp.lt.s32.totalorder %s197_s6, %s197_s6 }
  0x26   : > { %p1835_p3 = scmp.lt.s32.totalorder %s1826_s12, %s1826_s12 }
  0x27   : > { %p1829_p0 = pnand %p1827_p13, %p1791_p12 }
  0x28   : > { %p1836_p7 = por %p1835_p3, %p1834_p10 }
  0x29   : > { %p1830_p5 = pneg %p1829_p0 }
  0x2a   : > { %1685 = dma.hbm_to_vmem [thread:$0]  (!%p2076_p11), %s2408_s2, 512, %s184_s28, [#allocation7], %s1977_s8, %s1977_s8, %s1978_s9  }
  0x2b   : > { %p1837_p9 = pnand %p1836_p7, %p1830_p5 }
  0x2d   : > { %1840 = shalt.err (!%p1837_p9)
}
  0x2e   : > { %s2409_s3 = sld [smem:[#allocation20_spill]]  ;;  %s2105_s15 = sadd.s32 1, %s1973_s21  }
  0x2f   : > { %s32_s16 = sadd.s32 1, %s1969_s20  ;;  %s29_s17 = ssub.s32 %s1973_s21, %s2105_s15 }
  0x30   : > { %p39_p12 = scmp.ne.s32.totalorder %s1969_s20, %s1965_s19  ;;  %p30_p13 = scmp.eq.s32.totalorder %s29_s17, 0 }
  0x31   : > { %p40_p0 = scmp.eq.s32.totalorder %s1973_s21, 0  ;;  %p1702_p10 = scmp.lt.s32.totalorder %s1973_s21, 2 }
  0x32   : > { %p2115_p5 = por %p158_p2, %p39_p12  ;;  %s2124_s28 = sand.u32 1, %s1969_s20  }
  0x33   : > { %s2121_s27 = scalar_select %p30_p13, %s1969_s20, %s32_s16  }
  0x34   : > { %1688 = dma.hbm_to_vmem [thread:$0]  (!%p2076_p11), %s2409_s3, 512, %s197_s6, [#allocation10], %s1977_s8, %s1977_s8, %s1978_s9  }
  0x35   : > { %s2410_s23 = scalar_select %p2115_p5, 1, 0 }
  0x36   : > { %2411 = sst [smem:[#allocation17_spill]] %s2121_s27  ;;  %p41_p3 = por %p40_p0, %p39_p12 }
  0x37   : > { %s1500_s29 = sshll.u32 %s2124_s28, 4  ;;  %s1544_s30 = sshll.u32 %s1973_s21, 8 }
  0x38   : > { %s2412_s0 = sld [smem:[#allocation18_spill]]  ;;  %s217_s11 = scalar_lea.vmem [#allocation3], %s1500_s29 }
  0x39   : > { %s224_s12 = sshll.u32 %s217_s11, 4  ;;  %p2135_p2 = pnand %p1702_p10, %p41_p3  ;;  %s2133_s12 = int_to_ptr.vmem [resolvable:$true] %s224_s12 }
  0x3b   : > { %p1843_p7 = pneg %p2135_p2 }
  0x3e   : > { %s2131_s10 = scalar_lea.hbm %s2412_s0, %s1544_s30  ;;  %s1846_s6 = scalar_lea.hbm %s2412_s0, 512 }
  0x3f   : > { %s1841_s17 = scalar_lea.hbm %s2131_s10, 256  ;;  %p1847_p13 = scmp.lt.s32.totalorder %s2131_s10, %s2412_s0 }
  0x40   : > { %p1842_p11 = scmp.ne.s32.totalorder %s2131_s10, %s1841_s17  ;;  %p1848_p0 = scmp.lt.s32.totalorder %s1846_s6, %s1841_s17 }
  0x42   : > { %p1844_p9 = pnand %p1843_p7, %p1842_p11  ;;  %p1849_p10 = por %p1848_p0, %p1847_p13 }
  0x44   : > { %p1845_p12 = pneg %p1844_p9 }
  0x46   : > { %p1850_p3 = pnand %p1849_p10, %p1845_p12 }
  0x48   : > { %1853 = shalt.err (!%p1850_p3)
}
  0x49   : > { %s1854_s14 = scalar_lea.vmem %s2133_s12, 256  ;;  %s1979_s29 = smov [#allocation3]  }
  0x4a   : > { %p1855_p1 = scmp.ne.s32.totalorder %s2133_s12, %s1854_s14  ;;  %s1859_s30 = sshll.u32 %s1979_s29, 4  ;;  %s1860_s30 = int_to_ptr.vmem [resolvable:$false] %s1859_s30 }
  0x4b   : > { %s1861_s16 = scalar_lea.vmem %s1860_s30, 512  ;;  %p1862_p6 = scmp.lt.s32.totalorder %s2133_s12, %s1860_s30 }
  0x4c   : > { %p1857_p11 = pnand %p1855_p1, %p1843_p7  ;;  %p1863_p5 = scmp.lt.s32.totalorder %s1861_s16, %s1854_s14 }
  0x4e   : > { %p1858_p9 = pneg %p1857_p11  ;;  %p1864_p4 = por %p1863_p5, %p1862_p6 }
  0x50   : > { %p1865_p13 = pnand %p1864_p4, %p1858_p9 }
  0x52   : > { %1868 = shalt.err (!%p1865_p13)
}
  0x53   : > { %s2414_s17 = scalar_lea.sflag [#allocation4], %s2124_s28  ;;  %s1503_s6 = sshll.u32 %s1973_s21, 4 }
  0x54   : > { %1692 = dma.hbm_to_vmem [thread:$0]  (!%p2135_p2), %s2131_s10, 256, %s2133_s12, %s2414_s17, %s1977_s8, %s1977_s8, %s1978_s9  }
  0x55   : > { %s237_s7 = scalar_lea.vmem [#allocation6], %s2124_s28  ;;  %s242_s29 = scalar_lea.hbm %s2392_s1, %s1503_s6 }
  0x56   : > { %s244_s14 = sshll.u32 %s237_s7, 4  ;;  %s2415_s30 = sand.u32 1, %s1973_s21   ;;  %s245_s14 = int_to_ptr.vmem [resolvable:$true] %s244_s14 }
  0x57   : > { %s235_s0 = scalar_lea.sflag [#allocation7], %s2415_s30  ;;  %s1869_s2 = scalar_lea.hbm %s242_s29, 16 }
  0x58   : > { %p1870_p1 = scmp.ne.s32.totalorder %s242_s29, %s1869_s2  ;;  %s1874_s8 = scalar_lea.hbm %s2392_s1, 32 }
  0x59   : > { %p1875_p5 = scmp.lt.s32.totalorder %s242_s29, %s2392_s1  ;;  %p1876_p12 = scmp.lt.s32.totalorder %s1874_s8, %s1869_s2 }
  0x5a   : > { %p1872_p4 = pnand %p1870_p1, %p1843_p7 }
  0x5b   : > { %p1877_p0 = por %p1876_p12, %p1875_p5 }
  0x5c   : > { %p1873_p6 = pneg %p1872_p4 }
  0x5e   : > { %p1878_p10 = pnand %p1877_p0, %p1873_p6 }
  0x60   : > { %1881 = shalt.err (!%p1878_p10)
}
  0x61   : > { %s1882_s10 = scalar_lea.vmem %s245_s14, 16  ;;  %s1980_s12 = smov [#allocation6]  }
  0x62   : > { %p1883_p3 = scmp.ne.s32.totalorder %s245_s14, %s1882_s10  ;;  %s1887_s17 = sshll.u32 %s1980_s12, 4  ;;  %s1888_s17 = int_to_ptr.vmem [resolvable:$false] %s1887_s17 }
  0x63   : > { %s1889_s3 = scalar_lea.vmem %s1888_s17, 32  ;;  %p1890_p13 = scmp.lt.s32.totalorder %s245_s14, %s1888_s17 }
  0x64   : > { %p1885_p11 = pnand %p1883_p3, %p1843_p7  ;;  %p1891_p1 = scmp.lt.s32.totalorder %s1889_s3, %s1882_s10 }
  0x66   : > { %p1886_p9 = pneg %p1885_p11  ;;  %p1892_p4 = por %p1891_p1, %p1890_p13 }
  0x68   : > { %p1893_p8 = pnand %p1892_p4, %p1886_p9 }
  0x6a   : > { %1896 = shalt.err (!%p1893_p8)
}
  0x6b   : > { %1695 = dma.hbm_to_vmem [thread:$0]  (!%p2135_p2), %s242_s29, 16, %s245_s14, %s235_s0  }
  0x6c   : > { %p2416_p6 = scmp.ne.s32.totalorder %s2406_s26, 0 }
  0x6d   : > { %s2194_s2 = sand.u32 (!%p2416_p6), 1, %s1965_s19   ;;  %p2417_p7 = scmp.ne.s32.totalorder (!%p2416_p6), %s2404_s24, 0 }
  0x6e   : > { %253 = sbr.rel (%p2416_p6) target bundleno = 3062 (0xbf6), region = 40  ;;  %s1505_s27 = sshll.u32 (!%p2416_p6), %s2194_s2, 4 }
  0x6f   : > { %s256_s6 = scalar_lea.sflag (!%p2416_p6), [#allocation4], %s2194_s2  ;;  %s259_s7 = scalar_lea.vmem (!%p2416_p6), [#allocation3], %s1505_s27 }
  0x73   : > { %1940 = dma.done.wait (%p2417_p7), %s256_s6, 256  }
  0x74   : > { %1942 = vsyncadd (%p2417_p7), %s256_s6, 4294967040  ;;  %s264_s0 = sand.u32 1, %s2048_s22   ;;  %s267_s13 = scalar_lea.vmem [#allocation6], %s2194_s2 }
  0x75   : > { %s265_s26 = scalar_lea.sflag [#allocation7], %s264_s0 }
  0x76   : > { %1944 = dma.done.wait (%p2417_p7), %s265_s26, 16  }
  0x77   : > { %1946 = vsyncadd (%p2417_p7), %s265_s26, 4294967280  ;;  %p2418_p8 = scmp.eq.s32.totalorder %s2048_s22, 0 }
  0x79   : > { %1948 = dma.done.wait (%p2418_p8), [#allocation7], 512   ;;  %p2419_p2 = pmov %p2418_p8 }
  0x7b   : > { %1950 = vsyncadd (%p2419_p2), [#allocation7], 4294966784  ;;  %p2420_p5 = pmov %p2419_p2 }
  0x7c   : > { %p2421_p12 = pmov %p2419_p2 }
  0x7d   : > { %1952 = dma.done.wait (%p2420_p5), [#allocation10], 512  }
  0x7e   : > { %1954 = vsyncadd (%p2421_p12), [#allocation10], 4294966784  ;;  %vm312_vm0 = vcmask 261120   ;;  %v311_v0 = vld [vmem:[#allocation8 + $0x18] sm:$0xff]  ;;  %v310_v1 = vld [vmem:[#allocation8 + $0x10] sm:$0xff]  ;;  %s1981_s24 = smov 96   ;;  %v397_v21 = vlaneseq }
  0x7f   : > { %1590 = vmatprep.subr.mxu0 %v311_v0  ;;  %v306_v2 = vld [vmem:[%s259_s7] sm:$0xff]  ;;  %v307_v5 = vld [vmem:[%s259_s7 + $0x8] sm:$0xff]  ;;  %vm418_vm1 = vcmask 64512   ;;  %vm504_vm2 = vcmask 130048   ;;  %s1982_s14 = smov 64   ;;  %s1983_s16 = smov 120  }
  0x80   : > { %1591 = vmatpush3.msra.mxu0 %v311_v0  ;;  %v309_v3 = vld [vmem:[#allocation8 + $0x8] sm:$0xff]  ;;  %1598 = vmatprep.mubr.msk.f32.mxu0 %vm312_vm0, %v306_v2  ;;  %v308_v4 = vld [vmem:[#allocation8] sm:$0xff]  ;;  %v398_v23 = vshrl.u32 %v397_v21, 7  ;;  %v401_v24 = vand.u32 127, %v397_v21  ;;  %s1984_s11 = smov 88   ;;  %s1985_s29 = smov 56  }
  0x81   : > { %1592 = vmatprep.subr.mxu0 %v310_v1  ;;  %v1511_v25 = vld [vmem:[%s267_s13] ss:$0 sm:$0xff]  ;;  %s1986_s30 = smov 80   ;;  %s1987_s8 = smov 112   ;;  %vm836_vm5 = vcmask 130112   ;;  %vm1053_vm6 = vcmask 195712  }
  0x82   : > { %1593 = vmatpush3.msra.mxu0 %v310_v1  ;;  %vm402_vm3 = vcmp.eq.s32.totalorder %v398_v23, %v401_v24  ;;  %v399_v26 = vadd.s32 8, %v398_v23  ;;  %s1988_s9 = smov 48   ;;  %s1989_s28 = smov 72   ;;  %vm1270_vm7 = vcmask 261312  }
  0x83   : > { %1594 = vmatprep.subr.mxu0 %v309_v3  ;;  %v2244_v27 = vsel %vm402_vm3, 1.0, %v1511_v25  ;;  %s1990_s10 = smov 104   ;;  %s1991_s12 = smov 40  }
  0x84   : > { %1595 = vmatpush3.msra.mxu0 %v309_v3  ;;  %vm403_vm4 = vcmp.eq.s32.totalorder %v399_v26, %v401_v24  ;;  %s1992_s17 = smov 8   ;;  %s1993_s3 = smov 16  }
  0x85   : > { %1596 = vmatprep.subr.mxu0 %v308_v4  ;;  %v2247_v30 = vsel %vm403_vm4, 1.0, %v1511_v25  ;;  %s1994_s6 = smov 24   ;;  %s305_s26 = scalar_lea.vmem [#allocation11], %s1505_s27 }
  0x86   : > { %1597 = vmatpush3.msra.mxu0 %v308_v4  ;;  %s1383_s13 = sshll.u32 %s305_s26, 4  ;;  %s1370_s27 = scalar_lea.sflag [#allocation5], %s2194_s2  ;;  %s2340_s13 = int_to_ptr.vmem [resolvable:$true] %s1383_s13 }
  0x87   : > { %1599 = vmatmul.mubr.msk.f32.vlgmr.msra.gmra.mxu0 %vm312_vm0, %v307_v5  ;;  %p2422_p10 = scmp.ne.s32.totalorder %s2410_s23, 0 }
 0x147   : > { %v2220_v6 = vpop.f32.mrf.mxu0 }
 0x148   : > { %416 = vrot.lane.b32.xlu0 %v2220_v6, %s1981_s24  ;;  %v2236_v11 = vmul.f32 0.35355338, %v2220_v6 }
 0x149   : > { %v2223_v7 = vpop.f32.mrf.mxu0 }
 0x14a   : > { %v2226_v8 = vmul.f32 0.35355338, %v2223_v7 }
 0x14c   : > { %414 = vrot.lane.b32.xlu0 %v2223_v7, %s1981_s24  ;;  %1605 = vmatprep.mubr.msk.f32.mxu1 %vm418_vm1, %v2226_v8  ;;  %s1545_s24 = sshll.u32 %s2048_s22, 8  ;;  %s1995_s22 = smov [#allocation11]  }
 0x1ba   : > { %v417_v9 = vpop.permute.xlu0 %416 }
 0x1bb   : > { %1601 = vmatprep.subr.msk.mxu1 %vm418_vm1, %v417_v9 }
 0x1bc   : > { %1602 = vmatpush3.xpose.msk.msra.mxu1 %vm418_vm1, %v417_v9 }
 0x1be   : > { %v415_v10 = vpop.permute.xlu0 %414 }
 0x1bf   : > { %1603 = vmatprep.subr.msk.mxu1 %vm418_vm1, %v415_v10 }
 0x1c0   : > { %1604 = vmatpush3.xpose.msk.msra.mxu1 %vm418_vm1, %v415_v10 }
 0x1c3   : > { %1606 = vmatmul.mubr.msk.f32.vlgmr.msra.gmra.mxu1 %vm418_vm1, %v2236_v11 }
 0x283   : > { %v1607_v12 = vpop.f32.mrf.mxu1 }
 0x284   : > { %v508_v15 = vsel %vm504_vm2, %v1607_v12, -inf }
 0x285   : > { %v495_v13 = vpop.f32.mrf.mxu1 }
 0x286   : > { %v505_v14 = vsel %vm504_vm2, %v495_v13, -inf }
 0x287   : > { %506 = vmax.xlane.f32.xlu1 %v505_v14 }
 0x28b   : > { %509 = vmax.xlane.f32.xlu1 %v508_v15 }
 0x310   : > { %v507_v16 = vpop.xlane.xlu1 %506 }
 0x311   : > { %v511_v17 = vsub.f32 %v495_v13, %v507_v16 }
 0x313   : > { %v513_v18 = vmul.f32 1.442695, %v511_v17 }
 0x314   : > { %v510_v19 = vpop.xlane.xlu1 %509 }
 0x315   : > { %1757 = vpow2.f32 %v513_v18  ;;  %v512_v20 = vsub.f32 %v1607_v12, %v510_v19 }
 0x317   : > { %v515_v22 = vmul.f32 1.442695, %v512_v20 }
 0x319   : > { %1759 = vpow2.f32 %v515_v22 }
 0x322   : > { %v1758_v28 = vpop.eup %1757 }
 0x323   : > { %v517_v29 = vmul.f32 %v1758_v28, %v2244_v27 }
 0x325   : > { %v519_v31 = vsel %vm504_vm2, %v517_v29, 0.0  ;;  %v529_v41 = vadd.f32 6.25e-08, %v517_v29 }
 0x326   : > { %v1760_v32 = vpop.eup %1759  ;;  %520 = vadd.xlane.f32.xlu0 %v519_v31 }
 0x327   : > { %v518_v33 = vmul.f32 %v1760_v32, %v2247_v30 }
 0x329   : > { %v522_v34 = vsel %vm504_vm2, %v518_v33, 0.0  ;;  %v530_v45 = vadd.f32 6.25e-08, %v518_v33 }
 0x32a   : > { %523 = vadd.xlane.f32.xlu1 %v522_v34 }
 0x33b   : > { %535 = vrot.lane.b32.xlu1 %v2220_v6, %s1982_s14 }
 0x33c   : > { %622 = vrot.lane.b32.xlu0 %v2226_v8, %s1983_s16 }
 0x33f   : > { %533 = vrot.lane.b32.xlu1 %v2223_v7, %s1982_s14 }
 0x343   : > { %628 = vrot.lane.b32.xlu1 %v2220_v6, %s1984_s11 }
 0x347   : > { %626 = vrot.lane.b32.xlu1 %v2223_v7, %s1984_s11  ;;  %s2346_s11 = scalar_lea.hbm %s2396_s5, %s1545_s24 }
 0x34b   : > { %624 = vrot.lane.b32.xlu1 %v2236_v11, %s1983_s16 }
 0x3af   : > { %v521_v35 = vpop.xlane.xlu0 %520 }
 0x3b0   : > { %v525_v36 = vadd.f32 1e-06, %v521_v35 }
 0x3b2   : > { %1761 = vrcp.f32 %v525_v36 }
 0x3b3   : > { %v524_v37 = vpop.xlane.xlu1 %523  ;;  %v623_v48 = vpop.permute.xlu0 %622 }
 0x3b4   : > { %v526_v38 = vadd.f32 1e-06, %v524_v37 }
 0x3b6   : > { %1763 = vrcp.f32 %v526_v38 }
 0x3b7   : > { %v536_v39 = vpop.permute.xlu1 %535 }
 0x3b8   : > { %1608 = vmatprep.subr.mxu1 %v536_v39 }
 0x3b9   : > { %1609 = vmatpush3.msra.mxu1 %v536_v39 }
 0x3bb   : > { %v534_v40 = vpop.permute.xlu1 %533 }
 0x3bc   : > { %1610 = vmatprep.subr.mxu1 %v534_v40 }
 0x3bd   : > { %1611 = vmatpush3.msra.mxu1 %v534_v40 }
 0x3bf   : > { %v1762_v42 = vpop.eup %1761  ;;  %v629_v43 = vpop.permute.xlu1 %628 }
 0x3c0   : > { %1615 = vmatprep.subr.msk.mxu1 %vm418_vm1, %v629_v43  ;;  %v531_v44 = vmul.f32 %v1762_v42, %v529_v41 }
 0x3c2   : > { %1612 = vmatprep.mubr.msk.f32.mxu1 %vm504_vm2, %v531_v44 }
 0x3c3   : > { %v1764_v46 = vpop.eup %1763  ;;  %v627_v49 = vpop.permute.xlu1 %626 }
 0x3c4   : > { %v532_v47 = vmul.f32 %v1764_v46, %v530_v45 }
 0x3c6   : > { %1613 = vmatmul.mubr.msk.f32.vlgmr.msra.gmra.mxu1 %vm504_vm2, %v532_v47 }
 0x3c7   : > { %1616 = vmatpush3.xpose.msk.msra.mxu1 %vm418_vm1, %v629_v43  ;;  %1619 = vmatprep.mubr.msk.f32.mxu1 %vm418_vm1, %v623_v48  ;;  %v625_v50 = vpop.permute.xlu1 %624 }
 0x3c8   : > { %1617 = vmatprep.subr.msk.mxu1 %vm418_vm1, %v627_v49 }
 0x3cb   : > { %1618 = vmatpush3.xpose.msk.msra.mxu1 %vm418_vm1, %v627_v49 }
 0x3ce   : > { %1620 = vmatmul.mubr.msk.f32.vlgmr.msra.gmra.mxu1 %vm418_vm1, %v625_v50 }
 0x486   : > { %v1614_v51 = vpop.f32.mrf.mxu1 }
 0x487   : > { %621 = vst.msk [vmem:[#allocation2 + $0x8] sm:$0xff] %vm418_vm1, %v1614_v51 }
 0x488   : > { %v611_v52 = vpop.f32.mrf.mxu1 }
 0x489   : > { %620 = vst.msk [vmem:[#allocation2] sm:$0xff] %vm418_vm1, %v611_v52 }
 0x48e   : > { %v1621_v53 = vpop.f32.mrf.mxu1 }
 0x48f   : > { %v716_v54 = vsel %vm504_vm2, %v1621_v53, -inf }
 0x490   : > { %717 = vmax.xlane.f32.xlu0 %v716_v54  ;;  %v704_v55 = vpop.f32.mrf.mxu1 }
 0x491   : > { %v713_v56 = vsel %vm504_vm2, %v704_v55, -inf }
 0x492   : > { %714 = vmax.xlane.f32.xlu1 %v713_v56 }
 0x4a3   : > { %743 = vrot.lane.b32.xlu1 %v2220_v6, %s1985_s29 }
 0x4a6   : > { %741 = vrot.lane.b32.xlu0 %v2223_v7, %s1985_s29  ;;  %s1897_s29 = scalar_lea.vmem %s2340_s13, 256 }
 0x4a7   : > { %845 = vrot.lane.b32.xlu1 %v2220_v6, %s1986_s30  ;;  %p1898_p0 = scmp.ne.s32.totalorder %s2340_s13, %s1897_s29 }
 0x4a9   : > { %p1899_p3 = pnand %p1898_p0, %p2422_p10 }
 0x4aa   : > { %839 = vrot.lane.b32.xlu0 %v2226_v8, %s1987_s8 }
 0x4ab   : > { %p1900_p11 = pneg %p1899_p3 }
 0x519   : > { %v718_v57 = vpop.xlane.xlu0 %717 }
 0x51a   : > { %v720_v58 = vsub.f32 %v1621_v53, %v718_v57 }
 0x51b   : > { %v715_v59 = vpop.xlane.xlu1 %714 }
 0x51c   : > { %v723_v60 = vmul.f32 1.442695, %v720_v58  ;;  %v719_v61 = vsub.f32 %v704_v55, %v715_v59 }
 0x51d   : > { %v742_v0 = vpop.permute.xlu0 %741 }
 0x51e   : > { %1765 = vpow2.f32 %v723_v60  ;;  %v721_v62 = vmul.f32 1.442695, %v719_v61 }
 0x51f   : > { %v744_v63 = vpop.permute.xlu1 %743 }
 0x520   : > { %1767 = vpow2.f32 %v721_v62  ;;  %1622 = vmatprep.subr.mxu0 %v744_v63 }
 0x521   : > { %1623 = vmatpush3.msra.mxu0 %v744_v63  ;;  %v840_v22 = vpop.permute.xlu0 %839 }
 0x522   : > { %1624 = vmatprep.subr.mxu0 %v742_v0 }
 0x523   : > { %1625 = vmatpush3.msra.mxu0 %v742_v0  ;;  %v846_v1 = vpop.permute.xlu1 %845 }
 0x524   : > { %1629 = vmatprep.subr.msk.mxu0 %vm418_vm1, %v846_v1 }
 0x52b   : > { %v1766_v2 = vpop.eup %1765 }
 0x52c   : > { %v726_v3 = vmul.f32 %v1766_v2, %v2247_v30 }
 0x52d   : > { %v1768_v4 = vpop.eup %1767 }
 0x52e   : > { %v730_v5 = vsel %vm504_vm2, %v726_v3, 0.0  ;;  %v725_v9 = vmul.f32 %v1768_v4, %v2244_v27  ;;  %v738_v19 = vadd.f32 6.25e-08, %v726_v3 }
 0x52f   : > { %731 = vadd.xlane.f32.xlu1 %v730_v5 }
 0x530   : > { %v727_v10 = vsel %vm504_vm2, %v725_v9, 0.0  ;;  %v737_v17 = vadd.f32 6.25e-08, %v725_v9 }
 0x533   : > { %728 = vadd.xlane.f32.xlu1 %v727_v10 }
 0x544   : > { %843 = vrot.lane.b32.xlu1 %v2223_v7, %s1986_s30  ;;  %s1901_s30 = sshll.u32 %s1995_s22, 4  ;;  %s1902_s30 = int_to_ptr.vmem [resolvable:$false] %s1901_s30 }
 0x545   : > { %p1904_p9 = scmp.lt.s32.totalorder %s2340_s13, %s1902_s30 }
 0x548   : > { %841 = vrot.lane.b32.xlu1 %v2236_v11, %s1987_s8  ;;  %s1903_s8 = scalar_lea.vmem %s1902_s30, 512 }
 0x549   : > { %p1905_p13 = scmp.lt.s32.totalorder %s1903_s8, %s1897_s29 }
 0x54b   : > { %p1906_p1 = por %p1905_p13, %p1904_p9 }
 0x54d   : > { %p1907_p4 = pnand %p1906_p1, %p1900_p11 }
 0x5b8   : > { %v732_v12 = vpop.xlane.xlu1 %731 }
 0x5b9   : > { %v734_v13 = vadd.f32 1e-06, %v732_v12 }
 0x5bb   : > { %1769 = vrcp.f32 %v734_v13 }
 0x5bc   : > { %v729_v14 = vpop.xlane.xlu1 %728 }
 0x5bd   : > { %v733_v15 = vadd.f32 1e-06, %v729_v14 }
 0x5bf   : > { %1771 = vrcp.f32 %v733_v15 }
 0x5c0   : > { %v844_v23 = vpop.permute.xlu1 %843 }
 0x5c4   : > { %v842_v24 = vpop.permute.xlu1 %841 }
 0x5c8   : > { %v1770_v16 = vpop.eup %1769 }
 0x5c9   : > { %v740_v21 = vmul.f32 %v1770_v16, %v738_v19 }
 0x5cc   : > { %v1772_v18 = vpop.eup %1771 }
 0x5cd   : > { %v739_v20 = vmul.f32 %v1772_v18, %v737_v17 }
 0x5cf   : > { %1626 = vmatprep.mubr.msk.f32.mxu0 %vm504_vm2, %v739_v20 }
 0x5d0   : > { %1627 = vmatmul.mubr.msk.f32.vlgmr.msra.gmra.mxu0 %vm504_vm2, %v740_v21 }
 0x5d1   : > { %1630 = vmatpush3.xpose.msk.msra.mxu0 %vm418_vm1, %v846_v1  ;;  %1633 = vmatprep.mubr.msk.f32.mxu0 %vm418_vm1, %v840_v22 }
 0x5d2   : > { %1631 = vmatprep.subr.msk.mxu0 %vm418_vm1, %v844_v23 }
 0x5d5   : > { %1632 = vmatpush3.xpose.msk.msra.mxu0 %vm418_vm1, %v844_v23 }
 0x5d8   : > { %1634 = vmatmul.mubr.msk.f32.vlgmr.msra.gmra.mxu0 %vm418_vm1, %v842_v24 }
 0x690   : > { %v2288_v25 = vpop.f32.mrf.mxu0 }
 0x692   : > { %v2290_v26 = vpop.f32.mrf.mxu0 }
 0x698   : > { %v1635_v28 = vpop.f32.mrf.mxu0 }
 0x699   : > { %v933_v29 = vsel %vm504_vm2, %v1635_v28, -inf }
 0x69a   : > { %934 = vmax.xlane.f32.xlu1 %v933_v29  ;;  %v921_v31 = vpop.f32.mrf.mxu0 }
 0x69b   : > { %v930_v32 = vsel %vm504_vm2, %v921_v31, -inf }
 0x69c   : > { %931 = vmax.xlane.f32.xlu0 %v930_v32  ;;  %v1277_v32 = vld [vmem:[#allocation9 + $0x10] sm:$0xff] }
 0x6ab   : > { %960 = vrot.lane.b32.xlu1 %v2220_v6, %s1988_s9 }
 0x6af   : > { %1062 = vrot.lane.b32.xlu1 %v2220_v6, %s1989_s28 }
 0x6b3   : > { %1060 = vrot.lane.b32.xlu1 %v2223_v7, %s1989_s28 }
 0x6b7   : > { %1058 = vrot.lane.b32.xlu1 %v2236_v11, %s1990_s10 }
 0x723   : > { %v935_v33 = vpop.xlane.xlu1 %934 }
 0x724   : > { %v937_v34 = vsub.f32 %v1635_v28, %v935_v33  ;;  %v1276_v33 = vld [vmem:[#allocation9 + $0x8] sm:$0xff] }
 0x725   : > { %v932_v35 = vpop.xlane.xlu0 %931 }
 0x726   : > { %v940_v36 = vmul.f32 1.442695, %v937_v34  ;;  %v936_v37 = vsub.f32 %v921_v31, %v932_v35  ;;  %v1278_v31 = vld [vmem:[#allocation9 + $0x18] sm:$0xff]  ;;  %v1275_v34 = vld [vmem:[#allocation9] sm:$0xff] }
 0x727   : > { %v961_v38 = vpop.permute.xlu1 %960 }
 0x728   : > { %1773 = vpow2.f32 %v940_v36  ;;  %v938_v39 = vmul.f32 1.442695, %v936_v37  ;;  %1636 = vmatprep.subr.mxu1 %v961_v38 }
 0x729   : > { %1637 = vmatpush3.msra.mxu1 %v961_v38 }
 0x72a   : > { %1775 = vpow2.f32 %v938_v39 }
 0x72b   : > { %v1063_v50 = vpop.permute.xlu1 %1062 }
 0x72f   : > { %v1061_v57 = vpop.permute.xlu1 %1060 }
 0x733   : > { %v1059_v58 = vpop.permute.xlu1 %1058 }
 0x735   : > { %v1774_v40 = vpop.eup %1773 }
 0x736   : > { %v943_v41 = vmul.f32 %v1774_v40, %v2247_v30 }
 0x737   : > { %v1776_v42 = vpop.eup %1775 }
 0x738   : > { %v947_v43 = vsel %vm504_vm2, %v943_v41, 0.0  ;;  %v942_v44 = vmul.f32 %v1776_v42, %v2244_v27  ;;  %v955_v54 = vadd.f32 6.25e-08, %v943_v41  ;;  %v1536_v41 = vld [vmem:[%s2395_s4] ss:$0 sm:$0xff] }
 0x739   : > { %948 = vadd.xlane.f32.xlu0 %v947_v43 }
 0x73a   : > { %v944_v11 = vsel %vm504_vm2, %v942_v44, 0.0  ;;  %v954_v52 = vadd.f32 6.25e-08, %v942_v44 }
 0x73d   : > { %945 = vadd.xlane.f32.xlu0 %v944_v11 }
 0x753   : > { %958 = vrot.lane.b32.xlu0 %v2223_v7, %s1988_s9 }
 0x757   : > { %1056 = vrot.lane.b32.xlu0 %v2226_v8, %s1990_s10 }
 0x7c2   : > { %v949_v45 = vpop.xlane.xlu0 %948 }
 0x7c3   : > { %v951_v46 = vadd.f32 1e-06, %v949_v45 }
 0x7c5   : > { %1777 = vrcp.f32 %v951_v46 }
 0x7c6   : > { %v946_v47 = vpop.xlane.xlu0 %945 }
 0x7c7   : > { %v950_v48 = vadd.f32 1e-06, %v946_v47 }
 0x7c9   : > { %1779 = vrcp.f32 %v950_v48 }
 0x7ca   : > { %v959_v49 = vpop.permute.xlu0 %958 }
 0x7cb   : > { %1638 = vmatprep.subr.mxu1 %v959_v49 }
 0x7cc   : > { %1639 = vmatpush3.msra.mxu1 %v959_v49 }
 0x7cd   : > { %1643 = vmatprep.subr.msk.mxu1 %vm418_vm1, %v1063_v50 }
 0x7ce   : > { %v1057_v8 = vpop.permute.xlu0 %1056 }
 0x7d2   : > { %v1778_v51 = vpop.eup %1777 }
 0x7d3   : > { %v957_v56 = vmul.f32 %v1778_v51, %v955_v54 }
 0x7d6   : > { %v1780_v53 = vpop.eup %1779 }
 0x7d7   : > { %v956_v55 = vmul.f32 %v1780_v53, %v954_v52 }
 0x7d9   : > { %1640 = vmatprep.mubr.msk.f32.mxu1 %vm504_vm2, %v956_v55 }
 0x7da   : > { %1641 = vmatmul.mubr.msk.f32.vlgmr.msra.gmra.mxu1 %vm504_vm2, %v957_v56 }
 0x7db   : > { %1644 = vmatpush3.xpose.msk.msra.mxu1 %vm418_vm1, %v1063_v50  ;;  %1647 = vmatprep.mubr.msk.f32.mxu1 %vm418_vm1, %v1057_v8 }
 0x7dc   : > { %1645 = vmatprep.subr.msk.mxu1 %vm418_vm1, %v1061_v57 }
 0x7df   : > { %1646 = vmatpush3.xpose.msk.msra.mxu1 %vm418_vm1, %v1061_v57 }
 0x7e2   : > { %1648 = vmatmul.mubr.msk.f32.vlgmr.msra.gmra.mxu1 %vm418_vm1, %v1059_v58 }
 0x89a   : > { %v1642_v59 = vpop.f32.mrf.mxu1 }
 0x89c   : > { %v1036_v60 = vpop.f32.mrf.mxu1 }
 0x8a2   : > { %v1649_v61 = vpop.f32.mrf.mxu1 }
 0x8a3   : > { %v1150_v62 = vsel %vm504_vm2, %v1649_v61, -inf }
 0x8a4   : > { %1151 = vmax.xlane.f32.xlu1 %v1150_v62  ;;  %v1138_v63 = vpop.f32.mrf.mxu1 }
 0x8a5   : > { %v1147_v0 = vsel %vm504_vm2, %v1138_v63, -inf }
 0x8a6   : > { %1148 = vmax.xlane.f32.xlu0 %v1147_v0 }
 0x8b5   : > { %1177 = vrot.lane.b32.xlu1 %v2220_v6, %s1991_s12 }
 0x8b9   : > { %830 = vrot.lane.b32.xlu1 %v2290_v26, %s1992_s17 }
 0x8bd   : > { %832 = vrot.lane.b32.xlu1 %v2288_v25, %s1992_s17 }
 0x8c1   : > { %1049 = vrot.lane.b32.xlu1 %v1642_v59, %s1993_s3 }
 0x92d   : > { %v1152_v1 = vpop.xlane.xlu1 %1151 }
 0x92e   : > { %v1154_v2 = vsub.f32 %v1649_v61, %v1152_v1 }
 0x92f   : > { %v1149_v3 = vpop.xlane.xlu0 %1148 }
 0x930   : > { %v1157_v4 = vmul.f32 1.442695, %v1154_v2  ;;  %v1153_v5 = vsub.f32 %v1138_v63, %v1149_v3 }
 0x931   : > { %v1178_v9 = vpop.permute.xlu1 %1177 }
 0x932   : > { %1781 = vpow2.f32 %v1157_v4  ;;  %v1155_v10 = vmul.f32 1.442695, %v1153_v5  ;;  %1650 = vmatprep.subr.mxu0 %v1178_v9 }
 0x933   : > { %1651 = vmatpush3.msra.mxu0 %v1178_v9 }
 0x934   : > { %1783 = vpow2.f32 %v1155_v10 }
 0x935   : > { %v831_v6 = vpop.permute.xlu1 %830 }
 0x936   : > { %837 = vst.msk [vmem:[#allocation2] sm:$0xff] %vm836_vm5, %v831_v6 }
 0x939   : > { %v833_v12 = vpop.permute.xlu1 %832 }
 0x93a   : > { %838 = vst.msk [vmem:[#allocation2 + $0x8] sm:$0xff] %vm836_vm5, %v833_v12 }
 0x93d   : > { %v1050_v13 = vpop.permute.xlu1 %1049 }
 0x93e   : > { %1055 = vst.msk [vmem:[#allocation2 + $0x8] sm:$0xff] %vm1053_vm6, %v1050_v13 }
 0x93f   : > { %v1782_v14 = vpop.eup %1781 }
 0x940   : > { %v1160_v15 = vmul.f32 %v1782_v14, %v2247_v30 }
 0x941   : > { %v1784_v16 = vpop.eup %1783 }
 0x942   : > { %v1164_v17 = vsel %vm504_vm2, %v1160_v15, 0.0  ;;  %v1159_v18 = vmul.f32 %v1784_v16, %v2244_v27  ;;  %v1172_v28 = vadd.f32 6.25e-08, %v1160_v15 }
 0x943   : > { %1165 = vadd.xlane.f32.xlu0 %v1164_v17 }
 0x944   : > { %v1161_v19 = vsel %vm504_vm2, %v1159_v18, 0.0  ;;  %v1171_v25 = vadd.f32 6.25e-08, %v1159_v18 }
 0x947   : > { %1162 = vadd.xlane.f32.xlu0 %v1161_v19 }
 0x95d   : > { %1175 = vrot.lane.b32.xlu0 %v2223_v7, %s1991_s12 }
 0x961   : > { %1047 = vrot.lane.b32.xlu0 %v1036_v60, %s1993_s3 }
 0x9cc   : > { %v1166_v20 = vpop.xlane.xlu0 %1165 }
 0x9cd   : > { %v1168_v21 = vadd.f32 1e-06, %v1166_v20 }
 0x9cf   : > { %1785 = vrcp.f32 %v1168_v21 }
 0x9d0   : > { %v1163_v22 = vpop.xlane.xlu0 %1162 }
 0x9d1   : > { %v1167_v23 = vadd.f32 1e-06, %v1163_v22 }
 0x9d3   : > { %1787 = vrcp.f32 %v1167_v23 }
 0x9d4   : > { %v1176_v30 = vpop.permute.xlu0 %1175 }
 0x9d5   : > { %1652 = vmatprep.subr.mxu0 %v1176_v30 }
 0x9d6   : > { %1653 = vmatpush3.msra.mxu0 %v1176_v30 }
 0x9d7   : > { %1657 = vmatprep.subr.mxu0 %v1278_v31 }
 0x9d8   : > { %v1048_v24 = vpop.permute.xlu0 %1047 }
 0x9d9   : > { %1054 = vst.msk [vmem:[#allocation2] sm:$0xff] %vm1053_vm6, %v1048_v24 }
 0x9dc   : > { %v1786_v27 = vpop.eup %1785 }
 0x9dd   : > { %v1174_v7 = vmul.f32 %v1786_v27, %v1172_v28 }
 0x9e0   : > { %v1788_v26 = vpop.eup %1787 }
 0x9e1   : > { %v1173_v29 = vmul.f32 %v1788_v26, %v1171_v25 }
 0x9e3   : > { %1654 = vmatprep.mubr.msk.f32.mxu0 %vm504_vm2, %v1173_v29 }
 0x9e4   : > { %1655 = vmatmul.mubr.msk.f32.vlgmr.msra.gmra.mxu0 %vm504_vm2, %v1174_v7 }
 0x9e5   : > { %1658 = vmatpush3.msra.mxu0 %v1278_v31 }
 0x9e6   : > { %1659 = vmatprep.subr.mxu0 %v1277_v32 }
 0x9e7   : > { %1660 = vmatpush3.msra.mxu0 %v1277_v32 }
 0x9e8   : > { %1661 = vmatprep.subr.mxu0 %v1276_v33 }
 0x9e9   : > { %1662 = vmatpush3.msra.mxu0 %v1276_v33 }
 0x9ea   : > { %1663 = vmatprep.subr.mxu0 %v1275_v34 }
 0x9eb   : > { %1664 = vmatpush3.msra.mxu0 %v1275_v34 }
 0xaa4   : > { %v1656_v35 = vpop.f32.mrf.mxu0 }
 0xaa5   : > { %1266 = vrot.lane.b32.xlu1 %v1656_v35, %s1994_s6 }
 0xaa6   : > { %v1253_v36 = vpop.f32.mrf.mxu0 }
 0xaa7   : > { %1264 = vrot.lane.b32.xlu0 %v1253_v36, %s1994_s6 }
 0xb17   : > { %v1267_v37 = vpop.permute.xlu1 %1266 }
 0xb18   : > { %1272 = vst.msk [vmem:[#allocation2 + $0x8] sm:$0xff] %vm1270_vm7, %v1267_v37 }
 0xb19   : > { %v1265_v38 = vpop.permute.xlu0 %1264 }
 0xb1a   : > { %1271 = vst.msk [vmem:[#allocation2] sm:$0xff] %vm1270_vm7, %v1265_v38 }
 0xb1f   : > { %v1274_v40 = vld [vmem:[#allocation2 + $0x8] sm:$0xff] }
 0xb21   : > { %v1273_v39 = vld [vmem:[#allocation2] sm:$0xff] }
 0xb22   : > { %1665 = vmatprep.mubr.msk.f32.mxu0 %vm312_vm0, %v1273_v39 }
 0xb23   : > { %1666 = vmatmul.mubr.msk.f32.vlgmr.msra.gmra.mxu0 %vm312_vm0, %v1274_v40 }
 0xbe3   : > { %v1667_v42 = vpop.f32.mrf.mxu0 }
 0xbe4   : > { %v1364_v43 = vadd.f32 %v1667_v42, %v1536_v41 }
 0xbe5   : > { %v1358_v44 = vpop.f32.mrf.mxu0 }
 0xbe6   : > { %1368 = vst.msk [vmem:[%s305_s26 + $0x8] sm:$0xff] %vm312_vm0, %v1364_v43  ;;  %v1359_v11 = vadd.f32 %v1536_v41, %v1358_v44 }
 0xbe8   : > { %1367 = vst.msk [vmem:[%s305_s26] sm:$0xff] %vm312_vm0, %v1359_v11 }
 0xbe9   : > { %1910 = shalt.err (!%p1907_p4)
}
 0xbea   : > { %s1911_s9 = scalar_lea.hbm %s2346_s11, 256  ;;  %s1915_s12 = scalar_lea.hbm %s2396_s5, 512 }
 0xbeb   : > { %p1912_p6 = scmp.ne.s32.totalorder %s2346_s11, %s1911_s9  ;;  %p1916_p2 = scmp.lt.s32.totalorder %s2346_s11, %s2396_s5 }
 0xbec   : > { %p1917_p5 = scmp.lt.s32.totalorder %s1915_s12, %s1911_s9 }
 0xbed   : > { %p1913_p7 = pnand %p1912_p6, %p2422_p10 }
 0xbee   : > { %p1918_p12 = por %p1917_p5, %p1916_p2 }
 0xbef   : > { %p1914_p8 = pneg %p1913_p7 }
 0xbf1   : > { %p1919_p0 = pnand %p1918_p12, %p1914_p8 }
 0xbf3   : > { %1922 = shalt.err (!%p1919_p0)
}
 0xbf4   : > { %s1996_s7 = smov 128  }
 0xbf5   : > { %1680 = dma.vmem_to_hbm [thread:$0]  (%p2422_p10), %s2340_s13, 256, %s2346_s11, %s1370_s27, %s1996_s7, %s1996_s7, %s1992_s17  }
 0xbf6 PF: > { %s1398_s0 = sand.u32 1, %s1961_s18   ;;  %p2423_p3 = scmp.ne.s32.totalorder %s2405_s25, 0 }
 0xbf7   : > { %p2424_p11 = scmp.ge.s32.totalorder %s1973_s21, 2  ;;  %s1399_s26 = scalar_lea.sflag [#allocation5], %s1398_s0 }
 0xbf9   : > { %p1697_p9 = pnand %p2424_p11, %p2423_p3 }
 0xbfb   : > { %p1698_p13 = pneg %p1697_p9 }
 0xbfd   : > { %1956 = dma.done.wait (%p1698_p13), %s1399_s26, 256  }
 0xbfe   : > { %1958 = vsyncadd (%p1698_p13), %s1399_s26, 4294967040  ;;  %s2425_s23 = sld [smem:[#allocation17_spill]]  ;;  %p22_p1 = scmp.ge.s32.totalorder %s2105_s15, 4  }
 0xbff   : > { %s2426_s18 = smov %s1965_s19  ;;  %s2427_s19 = smov %s1969_s20 }
 0xc00   : > { %s2429_s21 = smov %s2105_s15  ;;  %24 = sbr.rel (!%p22_p1) target bundleno = 12 (0xc), region = 106 }
 0xc04   : > { %s2428_s20 = smov %s2425_s23 }
 0xc05   :  { %1404 = vsyncpa [#allocation4], 1 }
 0xc06   :  { %1406 = vsyncpa [#allocation4 + $0x1], 1 }
 0xc07   :  { %1407 = vsyncpa [#allocation7], 1 }
 0xc08   :  { %1409 = vsyncpa [#allocation7 + $0x1], 1 }
 0xc09   :  { %1410 = vsyncpa [#allocation10], 1 }
 0xc0a   :  { %1411 = vsyncpa [#allocation5], 1 }
 0xc0b   :  { %1413 = vsyncpa [#allocation5 + $0x1], 1 }

</bundles_post_ra>
